<compile_context>
chip_gen: v7x
topology: tpu7x:2x2x1
jax: 0.10.0
libtpu: 0.0.40
codegen_flags: <defaults>
</compile_context>

<pallas_src>
import functools

import jax
import jax.numpy as jnp
from jax import lax
from jax.experimental import pallas as pl
from jax.experimental.pallas import tpu as pltpu


_DP = 8          # point dim padded up to a multiple of 8 (zeros)
_BIG = 1.0e8     # sentinel coordinate for padded points (assumes |coords| << 1e8)


def _cdiv(a, b):
    return (a + b - 1) // b


def _round_up(a, m):
    return _cdiv(a, m) * m


def _pick_tile(n, t_cap):
    """Return (tile, n_tiles, padded_n); tile is a multiple of 128, <= t_cap."""
    t_cap = max(128, (int(t_cap) // 128) * 128)
    n_pad = _round_up(n, 128)
    tile = min(n_pad, t_cap)
    n_tiles = _cdiv(n_pad, tile)
    return tile, n_tiles, tile * n_tiles


def _chamfer_kernel(x_ref, yt_ref, dxy_ref, dyx_ref, accx_ref):
    # x_ref   : (1, TNx, Dp)  x tile (points on sublanes, dims on lanes)
    # yt_ref  : (1, Dp, TNy)  y tile, transposed (dims on sublanes, points on lanes)
    # dxy_ref : (1, TNx, 1)   per-x nearest sq. dist — resident across the Ny axis
    # dyx_ref : (1, 1, Nyp)   per-y nearest sq. dist — resident across Nx and Ny axes
    # accx_ref: (TNx, 128)    cross-j carry of the per-lane running min
    i = pl.program_id(1)
    j = pl.program_id(2)
    nj = pl.num_programs(2)

    x = x_ref[0]                                     # (TNx, Dp)
    xm2 = x * (-2.0)                                 # fold the -2 into the small tile
    xx_col = jnp.sum(x * x, axis=1, keepdims=True)   # (TNx, 1)

    tnx = x.shape[0]
    tny = yt_ref.shape[2]
    n_chunks = tny // 128
    j_base = j * tny

    @pl.when(jnp.logical_and(i == 0, j == 0))
    def _init_dyx():
        dyx_ref[...] = jnp.full(dyx_ref.shape, jnp.inf, dtype=dyx_ref.dtype)

    # --- fused chunk loop: matmul + both reductions per 128-lane column chunk ---
    def chunk_body(c, m):
        lo = pl.multiple_of(c * 128, 128)
        yt_c = yt_ref[0, :, pl.ds(lo, 128)]                        # (Dp, 128)
        yy_c = jnp.sum(yt_c * yt_c, axis=0, keepdims=True)         # (1, 128)
        xy2_c = lax.dot_general(xm2, yt_c,
                                dimension_numbers=(((1,), (0,)), ((), ())),
                                preferred_element_type=jnp.float32)  # (TNx, 128)
        t = xy2_c + yy_c                                           # yy - 2 x.y
        # x -> y : per-lane running min; cross-lane reduce deferred to finalize.
        m = jnp.minimum(m, t)
        # y -> x : sublane min over this x tile; clamp fused (max(0,.) monotone,
        # so min of clamped candidates == clamp of the global min).
        cand = jnp.maximum(jnp.min(t + xx_col, axis=0, keepdims=True), 0.0)  # (1,128)
        js = pl.multiple_of(j_base + lo, 128)
        dyx_ref[0, :, pl.ds(js, 128)] = jnp.minimum(
            dyx_ref[0, :, pl.ds(js, 128)], cand)
        return m

    m0 = jnp.full((tnx, 128), jnp.inf, dtype=jnp.float32)
    m = lax.fori_loop(0, n_chunks, chunk_body, m0)

    # Single cross-j merge per grid step (a trivial round trip when nJ == 1).
    @pl.when(j == 0)
    def _init_accx():
        accx_ref[...] = m

    @pl.when(j != 0)
    def _merge_accx():
        accx_ref[...] = jnp.minimum(accx_ref[...], m)

    @pl.when(j == nj - 1)
    def _finalize_dxy():
        row_min = jnp.min(accx_ref[...], axis=1, keepdims=True)    # (TNx, 1)
        dxy_ref[0, :, :] = jnp.maximum(xx_col + row_min, 0.0)


@functools.partial(jax.jit, static_argnames=("reduction", "tnx_max", "tny_max"))
def chamfer_loss(x, y, reduction="mean", tnx_max=1024, tny_max=None):
    """Pallas TPU implementation of CustomChamferLoss.forward
    (max_points=None, chunk_size=None).  x: (B, Nx, D), y: (B, Ny, D).
    tny_max=None -> auto: keep y VMEM-resident whenever the budget allows."""
    x = x.astype(jnp.float32)
    y = y.astype(jnp.float32)
    B, Nx, D = x.shape
    _, Ny, _ = y.shape

    # Shared per-batch centering (exact in real arithmetic): greatly improves
    # conditioning of ||x||^2 + ||y||^2 - 2 x.y for offset point clouds.
    c = 0.5 * (jnp.mean(x, axis=1, keepdims=True) +
               jnp.mean(y, axis=1, keepdims=True))
    x = x - c
    y = y - c

    Dp = max(_DP, _round_up(D, _DP))
    TNx, nI, Nxp = _pick_tile(Nx, tnx_max)

    # Per-generation VMEM budget: ~96 MiB on 128 MiB parts (v5e/v6e),
    # ~48 MiB on 64 MiB v7x.  Conservative fallback if no TPU info available.
    try:
        vmem_cap = int(pltpu.get_tpu_info().vmem_capacity_bytes)
    except Exception:
        vmem_cap = 64 * 1024 * 1024
    vmem_limit = max(32 * 1024 * 1024, min((vmem_cap * 3) // 4, 96 * 1024 * 1024))

    Nyp_min = _round_up(Ny, 128)
    fixed_bytes = 4 * (2 * TNx * Dp        # x block (double-buffered)
                       + 2 * TNx * 128     # dxy out block (lane-padded, dbuf)
                       + TNx * 128         # accx scratch
                       + 2 * 8 * Nyp_min   # dyx resident out (sublane-padded, dbuf)
                       + 8 * TNx * 128)    # working-set / spill headroom
    avail_y = vmem_limit - fixed_bytes - (4 << 20)   # compiler-internal scratch
    tny_budget = max(128, (avail_y // (2 * Dp * 4) // 128) * 128)
    tny_cap = tny_budget if tny_max is None else min(tny_budget, max(128, int(tny_max)))
    # TODO(synk): for Ny so large that the resident dyx row (~64*Nyp bytes)
    # approaches VMEM (e.g. Ny >~ 400k on v7x), split Ny across an outer axis.
    TNy, nJ, Nyp = _pick_tile(Ny, tny_cap)

    # Pad point dim with zeros (squared distances unchanged), then pad point
    # counts with far-away sentinel points so they never win a min.
    def _pad(p, n, n_pad):
        p = jnp.pad(p, ((0, 0), (0, 0), (0, Dp - D)))
        if n_pad > n:
            p = jnp.pad(p, ((0, 0), (0, n_pad - n), (0, 0)),
                        constant_values=_BIG)
        return p

    xp = _pad(x, Nx, Nxp)                              # (B, Nxp, Dp)
    ytp = jnp.transpose(_pad(y, Ny, Nyp), (0, 2, 1))   # (B, Dp, Nyp), lane-dense

    y_streams = 1 if nJ == 1 else nI
    flops = 2 * B * Nxp * Nyp * Dp + 8 * B * Nxp * Nyp
    bytes_accessed = 4 * (B * Nxp * Dp + B * Dp * Nyp * y_streams + B * Nxp + B * Nyp)

    dxy, dyx = pl.pallas_call(
        _chamfer_kernel,
        out_shape=(
            jax.ShapeDtypeStruct((B, Nxp, 1), jnp.float32),
            jax.ShapeDtypeStruct((B, 1, Nyp), jnp.float32),
        ),
        grid_spec=pltpu.PrefetchScalarGridSpec(
            num_scalar_prefetch=0,
            grid=(B, nI, nJ),
            in_specs=[
                pl.BlockSpec((1, TNx, Dp), lambda b, i, j: (b, i, 0)),
                # When nJ == 1 this block index is constant across i, so the
                # y tile stays resident in VMEM and is never re-streamed.
                pl.BlockSpec((1, Dp, TNy), lambda b, i, j: (b, 0, j)),
            ],
            out_specs=[
                pl.BlockSpec((1, TNx, 1), lambda b, i, j: (b, i, 0)),
                pl.BlockSpec((1, 1, Nyp), lambda b, i, j: (b, 0, 0)),
            ],
            scratch_shapes=[pltpu.VMEM((TNx, 128), jnp.float32)],
        ),
        compiler_params=pltpu.CompilerParams(
            dimension_semantics=("parallel", "arbitrary", "arbitrary"),
            vmem_limit_bytes=int(vmem_limit),
        ),
        cost_estimate=pl.CostEstimate(
            flops=int(flops), transcendentals=0,
            bytes_accessed=int(bytes_accessed)),
    )(xp, ytp)

    dist_x_to_y = dxy[:, :Nx, 0]     # (B, Nx)
    dist_y_to_x = dyx[:, 0, :Ny]     # (B, Ny)

    if reduction == "mean":
        return jnp.mean(jnp.mean(dist_x_to_y, axis=1) +
                        jnp.mean(dist_y_to_x, axis=1))
    if reduction == "sum":
        return jnp.sum(jnp.sum(dist_x_to_y, axis=1) +
                       jnp.sum(dist_y_to_x, axis=1))
    return dist_x_to_y, dist_y_to_x


def _reference_chamfer(x, y, reduction="mean"):
    """Pure-JAX reference reproducing _compute_full + reduction."""
    d = jnp.sum((x[:, :, None, :] - y[:, None, :, :]) ** 2, axis=-1)
    dxy = jnp.min(d, axis=2)
    dyx = jnp.min(d, axis=1)
    if reduction == "mean":
        return jnp.mean(jnp.mean(dxy, axis=1) + jnp.mean(dyx, axis=1))
    if reduction == "sum":
        return jnp.sum(jnp.sum(dxy, axis=1) + jnp.sum(dyx, axis=1))
    return dxy, dyx


if __name__ == "__main__":
    key = jax.random.PRNGKey(0)
    kx, ky, kx2, ky2 = jax.random.split(key, 4)

    # Case 1: unaligned point counts (sentinel padding), resident-y path (nJ == 1).
    B, Nx, Ny, D = 2, 200, 173, 3
    x = jax.random.normal(kx, (B, Nx, D), dtype=jnp.float32)
    y = jax.random.normal(ky, (B, Ny, D), dtype=jnp.float32)

    out_mean = jax.block_until_ready(chamfer_loss(x, y, reduction="mean"))
    ref_mean = _reference_chamfer(x, y, reduction="mean")
    assert jnp.allclose(out_mean, ref_mean, rtol=1e-4, atol=1e-3), (out_mean, ref_mean)

    out_sum = jax.block_until_ready(chamfer_loss(x, y, reduction="sum"))
    ref_sum = _reference_chamfer(x, y, reduction="sum")
    assert jnp.allclose(out_sum, ref_sum, rtol=1e-4, atol=1e-3), (out_sum, ref_sum)

    dxn, dyn = jax.block_until_ready(chamfer_loss(x, y, reduction="none"))
    rdx, rdy = _reference_chamfer(x, y, reduction="none")
    assert jnp.allclose(dxn, rdx, rtol=1e-4, atol=1e-3)
    assert jnp.allclose(dyn, rdy, rtol=1e-4, atol=1e-3)

    # Case 2: force small tiles so the multi-tile paths (cross-j accx merge,
    # cross-i dyx running min, streaming-y fallback) are exercised.
    x2 = jax.random.normal(kx2, (2, 300, 3), dtype=jnp.float32)
    y2 = jax.random.normal(ky2, (2, 260, 3), dtype=jnp.float32)
    out2 = jax.block_until_ready(
        chamfer_loss(x2, y2, reduction="mean", tnx_max=128, tny_max=128))
    ref2 = _reference_chamfer(x2, y2, reduction="mean")
    assert jnp.allclose(out2, ref2, rtol=1e-4, atol=1e-3), (out2, ref2)

    print("KERNEL_OK")
</pallas_src>

<mosaic_0001>
module attributes {stable_mosaic.version = 11 : i64} {
  func.func @_chamfer_kernel(%arg0: i32, %arg1: i32, %arg2: i32, %arg3: memref<1x256x8xf32, #tpu.memory_space<vmem>>, %arg4: memref<1x8x256xf32, #tpu.memory_space<vmem>>, %arg5: memref<1x256x1xf32, #tpu.memory_space<vmem>>, %arg6: memref<1x1x256xf32, #tpu.memory_space<vmem>>, %arg7: memref<256x128xf32, #tpu.memory_space<vmem>>) attributes {dimension_semantics = [#tpu.dimension_semantics<parallel>, #tpu.dimension_semantics<arbitrary>, #tpu.dimension_semantics<arbitrary>], iteration_bounds = array<i64: 2, 1, 1>, scalar_prefetch = 0 : i64, scratch_operands = 1 : i64, tpu.core_type = #tpu.core_type<tc>, window_params = [{transform_indices = @transform_0, window_bounds = array<i64: 1, 256, 8>}, {transform_indices = @transform_1, window_bounds = array<i64: 1, 8, 256>}, {transform_indices = @transform_2, window_bounds = array<i64: 1, 256, 1>}, {transform_indices = @transform_3, window_bounds = array<i64: 1, 1, 256>}]} {
    %c0 = arith.constant 0 : index
    %c0_0 = arith.constant 0 : index
    %c0_1 = arith.constant 0 : index
    %0 = vector.load %arg3[%c0, %c0_0, %c0_1] : memref<1x256x8xf32, #tpu.memory_space<vmem>>, vector<1x256x8xf32>
    %1 = vector.shape_cast %0 : vector<1x256x8xf32> to vector<256x8xf32>
    %cst = arith.constant -2.000000e+00 : f32
    %2 = vector.broadcast %cst : f32 to vector<256x8xf32>
    %3 = arith.mulf %1, %2 : vector<256x8xf32>
    %4 = arith.mulf %1, %1 : vector<256x8xf32>
    %cst_2 = arith.constant dense<0.000000e+00> : vector<256xf32>
    %5 = vector.multi_reduction <add>, %4, %cst_2 [1] : vector<256x8xf32> to vector<256xf32>
    %6 = vector.shape_cast %5 : vector<256xf32> to vector<256x1xf32>
    %c256_i32 = arith.constant 256 : i32
    %7 = arith.muli %arg2, %c256_i32 : i32
    %c0_i32 = arith.constant 0 : i32
    %8 = arith.cmpi eq, %arg1, %c0_i32 : i32
    %c0_i32_3 = arith.constant 0 : i32
    %9 = arith.cmpi eq, %arg2, %c0_i32_3 : i32
    %10 = arith.andi %8, %9 : i1
    %11 = arith.extui %10 : i1 to i32
    %c0_i32_4 = arith.constant 0 : i32
    %12 = arith.cmpi ne, %11, %c0_i32_4 : i32
    scf.if %12 {
      %cst_14 = arith.constant 0x7F800000 : f32
      %25 = vector.broadcast %cst_14 : f32 to vector<1x1x256xf32>
      %c0_15 = arith.constant 0 : index
      %c0_16 = arith.constant 0 : index
      %c0_17 = arith.constant 0 : index
      %26 = vector.load %arg6[%c0_15, %c0_16, %c0_17] : memref<1x1x256xf32, #tpu.memory_space<vmem>>, vector<1x1x256xf32>
      tpu.vector_store %arg6[%c0_15, %c0_16, %c0_17], %25 {strides = array<i32>} : memref<1x1x256xf32, #tpu.memory_space<vmem>>, vector<1x1x256xf32>,
    } else {
    }
    %cst_5 = arith.constant 0x7F800000 : f32
    %13 = vector.broadcast %cst_5 : f32 to vector<256x128xf32>
    %c0_i32_6 = arith.constant 0 : i32
    %c2_i32 = arith.constant 2 : i32
    %14 = arith.addi %c0_i32_6, %c2_i32 : i32
    %c1_i32 = arith.constant 1 : i32
    %15 = scf.for %arg8 = %c0_i32_6 to %14 step %c1_i32 iter_args(%arg9 = %13) -> (vector<256x128xf32>)  : i32 {
      %c128_i32 = arith.constant 128 : i32
      %25 = arith.muli %arg8, %c128_i32 : i32
      %26 = tpu.assume_multiple %25, 128 : i32
      %c0_14 = arith.constant 0 : index
      %c0_15 = arith.constant 0 : index
      %27 = arith.index_cast %26 : i32 to index
      %28 = vector.load %arg4[%c0_14, %c0_15, %27] : memref<1x8x256xf32, #tpu.memory_space<vmem>>, vector<1x8x128xf32>
      %29 = vector.shape_cast %28 : vector<1x8x128xf32> to vector<8x128xf32>
      %30 = arith.mulf %29, %29 : vector<8x128xf32>
      %cst_16 = arith.constant dense<0.000000e+00> : vector<128xf32>
      %31 = vector.multi_reduction <add>, %30, %cst_16 [0] : vector<8x128xf32> to vector<128xf32>
      %32 = vector.shape_cast %31 : vector<128xf32> to vector<1x128xf32>
      %cst_17 = arith.constant dense<0.000000e+00> : vector<256x128xf32>
      %33 = tpu.matmul %3, %29, %cst_17 {dimension_numbers = #tpu.dot_dimension_numbers<[1], [0], [0], [1], [0, 0, 1, 1], [], []>} : vector<256x8xf32>, vector<8x128xf32>, vector<256x128xf32> -> vector<256x128xf32>
      %34 = vector.broadcast %32 : vector<1x128xf32> to vector<256x128xf32>
      %35 = arith.addf %33, %34 : vector<256x128xf32>
      %36 = arith.minimumf %arg9, %35 : vector<256x128xf32>
      %37 = vector.broadcast %6 : vector<256x1xf32> to vector<256x128xf32>
      %38 = arith.addf %35, %37 : vector<256x128xf32>
      %cst_18 = arith.constant dense<0x7F800000> : vector<128xf32>
      %39 = vector.multi_reduction <minimumf>, %38, %cst_18 [0] : vector<256x128xf32> to vector<128xf32>
      %40 = vector.shape_cast %39 : vector<128xf32> to vector<1x128xf32>
      %cst_19 = arith.constant 0.000000e+00 : f32
      %41 = vector.broadcast %cst_19 : f32 to vector<1x128xf32>
      %42 = arith.maximumf %40, %41 : vector<1x128xf32>
      %43 = arith.addi %7, %26 : i32
      %44 = tpu.assume_multiple %43, 128 : i32
      %c0_20 = arith.constant 0 : index
      %c0_21 = arith.constant 0 : index
      %45 = arith.index_cast %44 : i32 to index
      %46 = vector.load %arg6[%c0_20, %c0_21, %45] : memref<1x1x256xf32, #tpu.memory_space<vmem>>, vector<1x1x128xf32>
      %47 = vector.shape_cast %46 : vector<1x1x128xf32> to vector<1x128xf32>
      %48 = arith.minimumf %47, %42 : vector<1x128xf32>
      %c0_22 = arith.constant 0 : index
      %c0_23 = arith.constant 0 : index
      %49 = arith.index_cast %44 : i32 to index
      %50 = vector.load %arg6[%c0_22, %c0_23, %49] : memref<1x1x256xf32, #tpu.memory_space<vmem>>, vector<1x1x128xf32>
      %51 = vector.shape_cast %50 : vector<1x1x128xf32> to vector<1x128xf32>
      %52 = vector.shape_cast %48 : vector<1x128xf32> to vector<1x1x128xf32>
      tpu.vector_store %arg6[%c0_22, %c0_23, %49], %52 {strides = array<i32>} : memref<1x1x256xf32, #tpu.memory_space<vmem>>, vector<1x1x128xf32>,
      scf.yield %36 : vector<256x128xf32>
    }
    %c2_i32_7 = arith.constant 2 : i32
    %c0_i32_8 = arith.constant 0 : i32
    %16 = arith.cmpi eq, %arg2, %c0_i32_8 : i32
    %17 = arith.extui %16 : i1 to i32
    %c0_i32_9 = arith.constant 0 : i32
    %18 = arith.cmpi ne, %17, %c0_i32_9 : i32
    scf.if %18 {
      %c0_14 = arith.constant 0 : index
      %c0_15 = arith.constant 0 : index
      %25 = vector.load %arg7[%c0_14, %c0_15] : memref<256x128xf32, #tpu.memory_space<vmem>>, vector<256x128xf32>
      tpu.vector_store %arg7[%c0_14, %c0_15], %15 {strides = array<i32>} : memref<256x128xf32, #tpu.memory_space<vmem>>, vector<256x128xf32>,
    } else {
    }
    %c0_i32_10 = arith.constant 0 : i32
    %19 = arith.cmpi ne, %arg2, %c0_i32_10 : i32
    %20 = arith.extui %19 : i1 to i32
    %c0_i32_11 = arith.constant 0 : i32
    %21 = arith.cmpi ne, %20, %c0_i32_11 : i32
    scf.if %21 {
      %c0_14 = arith.constant 0 : index
      %c0_15 = arith.constant 0 : index
      %25 = vector.load %arg7[%c0_14, %c0_15] : memref<256x128xf32, #tpu.memory_space<vmem>>, vector<256x128xf32>
      %26 = arith.minimumf %25, %15 : vector<256x128xf32>
      %c0_16 = arith.constant 0 : index
      %c0_17 = arith.constant 0 : index
      %27 = vector.load %arg7[%c0_16, %c0_17] : memref<256x128xf32, #tpu.memory_space<vmem>>, vector<256x128xf32>
      tpu.vector_store %arg7[%c0_16, %c0_17], %26 {strides = array<i32>} : memref<256x128xf32, #tpu.memory_space<vmem>>, vector<256x128xf32>,
    } else {
    }
    %c0_i32_12 = arith.constant 0 : i32
    %22 = arith.cmpi eq, %arg2, %c0_i32_12 : i32
    %23 = arith.extui %22 : i1 to i32
    %c0_i32_13 = arith.constant 0 : i32
    %24 = arith.cmpi ne, %23, %c0_i32_13 : i32
    scf.if %24 {
      %c0_14 = arith.constant 0 : index
      %c0_15 = arith.constant 0 : index
      %25 = vector.load %arg7[%c0_14, %c0_15] : memref<256x128xf32, #tpu.memory_space<vmem>>, vector<256x128xf32>
      %cst_16 = arith.constant dense<0x7F800000> : vector<256xf32>
      %26 = vector.multi_reduction <minimumf>, %25, %cst_16 [1] : vector<256x128xf32> to vector<256xf32>
      %27 = vector.shape_cast %26 : vector<256xf32> to vector<256x1xf32>
      %28 = arith.addf %6, %27 : vector<256x1xf32>
      %cst_17 = arith.constant 0.000000e+00 : f32
      %29 = vector.broadcast %cst_17 : f32 to vector<256x1xf32>
      %30 = arith.maximumf %28, %29 : vector<256x1xf32>
      %c0_18 = arith.constant 0 : index
      %c0_19 = arith.constant 0 : index
      %c0_20 = arith.constant 0 : index
      %31 = vector.load %arg5[%c0_18, %c0_19, %c0_20] : memref<1x256x1xf32, #tpu.memory_space<vmem>>, vector<1x256x1xf32>
      %32 = vector.shape_cast %31 : vector<1x256x1xf32> to vector<256x1xf32>
      %33 = vector.shape_cast %30 : vector<256x1xf32> to vector<1x256x1xf32>
      tpu.vector_store %arg5[%c0_18, %c0_19, %c0_20], %33 {strides = array<i32>} : memref<1x256x1xf32, #tpu.memory_space<vmem>>, vector<1x256x1xf32>,
    } else {
    }
    return
  }
  func.func @transform_0(%arg0: i32, %arg1: i32, %arg2: i32) -> (i32, i32, i32) {
    %c0_i32 = arith.constant 0 : i32
    %c0_i32_0 = arith.constant 0 : i32
    return %arg0, %arg1, %c0_i32 : i32, i32, i32
  }
  func.func @transform_1(%arg0: i32, %arg1: i32, %arg2: i32) -> (i32, i32, i32) {
    %c0_i32 = arith.constant 0 : i32
    %c0_i32_0 = arith.constant 0 : i32
    return %arg0, %c0_i32, %arg2 : i32, i32, i32
  }
  func.func @transform_2(%arg0: i32, %arg1: i32, %arg2: i32) -> (i32, i32, i32) {
    %c0_i32 = arith.constant 0 : i32
    %c0_i32_0 = arith.constant 0 : i32
    return %arg0, %arg1, %c0_i32 : i32, i32, i32
  }
  func.func @transform_3(%arg0: i32, %arg1: i32, %arg2: i32) -> (i32, i32, i32) {
    %c0_i32 = arith.constant 0 : i32
    %c0_i32_0 = arith.constant 0 : i32
    %c0_i32_1 = arith.constant 0 : i32
    return %arg0, %c0_i32, %c0_i32_0 : i32, i32, i32
  }
}

</mosaic_0001>

<bundles_post_ra>
// kernel: chamfer_loss.1
= control target key start
LH: loop header
LB: loop body
LE: loop exit
PB: predicated region body
PF: predicated region fallthrough
CT: control target
= control target key end

     0   :  { %s2262_s12 = smov 0   ;;  %s2264_s13 = smov 0   ;;  %s3181_s0 = inlined_call_operand.vmem [shape: f32[2,256,8], index: 0, kind: input, shape index: {}]   ;;  %s3182_s1 = inlined_call_operand.vmem [shape: f32[2,8,256], index: 1, kind: input, shape index: {}]   ;;  %s3183_s2 = inlined_call_operand.vmem [shape: f32[2,256,1], index: 2, kind: output, shape index: {0}]   ;;  %s3184_s3 = inlined_call_operand.vmem [shape: f32[2,1,256], index: 3, kind: output, shape index: {1}]  }
   0x1   :  { %s2266_s14 = smov 0  }
   0x2 LB: > { %s33_s15 = sadd.s32 1, %s2103_s13  ;;  %p1532_p0 = scmp.ge.s32.totalorder %s2107_s14, 1  ;;  %s2107_s14 = sphi %s2266_s14, %s14_s14   ;;  %s2103_s13 = sphi %s2264_s13, %s3422_s13   ;;  %s2099_s12 = sphi %s2262_s12, %s3421_s12  }
   0x3   : > { %p35_p1 = scmp.ge.s32.totalorder %s33_s15, 2  ;;  %p185_p2 = scmp.lt.s32.totalorder %s2107_s14, 3 }
   0x5   : > { %s3424_s15 = smov (%p35_p1, %s33_s15), 0  ;;  %p186_p3 = pnand %p1532_p0, %p185_p2 }
   0x7   : > { %189 = sbr.rel (%p186_p3) target bundleno = 698 (0x2ba), region = 28 }
   0xe   : > { %p231_p4 = scmp.lt.s32.totalorder %s2099_s12, 1  ;;  %v3185_v0 = vlaneseq  ;;  %vm360_vm1 = vcmask 64512   ;;  %v2241_v10 = vmov inf   ;;  %s2558_s4 = smov 0  }
  0x10   : > { %s3426_s12 = smov (!%p231_p4, %s2099_s12), 1  ;;  %vm466_vm0 = vcmp.lt.s32.totalorder %v3185_v0, 256 }
  0x11   : > { %s1576_s16 = sshll.u32 %s3426_s12, 8  ;;  %s1577_s17 = sshll.u32 %s3426_s12, 4 }
  0x12   : > { %s2283_s20 = scalar_lea.vmem %s3181_s0, %s1576_s16  ;;  %s2288_s23 = scalar_lea.vmem %s3182_s1, %s1577_s17 }
  0x13   : > { %s2294_s26 = scalar_lea.vmem %s3183_s2, %s1576_s16  ;;  %s1539_s27 = sshll.u32 %s3426_s12, 1  ;;  %v266_v1 = vld [vmem:[%s2283_s20 + $0x10] sm:$0xff]  ;;  %v264_v2 = vld [vmem:[%s2283_s20] sm:$0xff]  ;;  %v267_v3 = vld [vmem:[%s2283_s20 + $0x18] sm:$0xff] }
  0x14   : > { %s2302_s30 = scalar_lea.vmem %s3184_s3, %s1539_s27  ;;  %v330_v4 = vmul.f32 %v266_v1, %v266_v1  ;;  %v2304_v5 = vmul.f32 -2.0, %v266_v1  ;;  %v328_v6 = vmul.f32 %v264_v2, %v264_v2  ;;  %v2306_v7 = vmul.f32 -2.0, %v264_v2  ;;  %v265_v8 = vld [vmem:[%s2283_s20 + $0x8] sm:$0xff]  ;;  %v268_v15 = vld [vmem:[%s2283_s20 + $0x20] sm:$0xff]  ;;  %v271_v22 = vld [vmem:[%s2283_s20 + $0x38] sm:$0xff] }
  0x15   : > { %v269_v9 = vld [vmem:[%s2283_s20 + $0x28] sm:$0xff]  ;;  %468 = vst.msk [vmem:[%s2302_s30] sm:$0x3] %vm466_vm0, %v2241_v10  ;;  %v2311_v11 = vmul.f32 -2.0, %v267_v3  ;;  %v331_v12 = vmul.f32 %v267_v3, %v267_v3  ;;  %v2313_v13 = vmul.f32 -2.0, %v265_v8  ;;  %v329_v14 = vmul.f32 %v265_v8, %v265_v8  ;;  %v270_v23 = vld [vmem:[%s2283_s20 + $0x30] sm:$0xff] }
  0x16   : > { %3186 = vst [vmem:[#allocation3_spill] sm:$0xff] %v2304_v5  ;;  %3187 = vst [vmem:[#allocation4_spill] sm:$0xff] %v2306_v7  ;;  %v367_v16 = vsel %vm360_vm1, %v330_v4, 0.0  ;;  %v361_v17 = vsel %vm360_vm1, %v328_v6, 0.0  ;;  %v2318_v18 = vmul.f32 -2.0, %v269_v9  ;;  %v333_v20 = vmul.f32 %v269_v9, %v269_v9  ;;  %v273_v28 = vld [vmem:[%s2283_s20 + $0x48] sm:$0xff] }
  0x17   : > { %3188 = vst [vmem:[#allocation5_spill] sm:$0xff] %v2311_v11  ;;  %3189 = vst [vmem:[#allocation6_spill] sm:$0xff] %v2313_v13  ;;  %368 = vadd.xlane.f32.xlu1 %v367_v16  ;;  %362 = vadd.xlane.f32.xlu0 %v361_v17  ;;  %v370_v19 = vsel %vm360_vm1, %v331_v12, 0.0  ;;  %v2321_v21 = vmul.f32 -2.0, %v268_v15  ;;  %v364_v24 = vsel %vm360_vm1, %v329_v14, 0.0  ;;  %v332_v25 = vmul.f32 %v268_v15, %v268_v15  ;;  %v272_v30 = vld [vmem:[%s2283_s20 + $0x40] sm:$0xff] }
  0x18   : > { %3190 = vst [vmem:[#allocation7_spill] sm:$0xff] %v2318_v18  ;;  %v2326_v26 = vmul.f32 -2.0, %v271_v22  ;;  %v2328_v27 = vmul.f32 -2.0, %v270_v23  ;;  %v2331_v29 = vmul.f32 -2.0, %v273_v28  ;;  %v275_v31 = vld [vmem:[%s2283_s20 + $0x58] sm:$0xff]  ;;  %v2335_v32 = vmul.f32 -2.0, %v272_v30 }
  0x19   : > { %3191 = vst [vmem:[#allocation8_spill] sm:$0xff] %v2321_v21  ;;  %v2337_v33 = vmul.f32 -2.0, %v275_v31  ;;  %v274_v34 = vld [vmem:[%s2283_s20 + $0x50] sm:$0xff]  ;;  %v335_v35 = vmul.f32 %v271_v22, %v271_v22  ;;  %v277_v37 = vld [vmem:[%s2283_s20 + $0x68] sm:$0xff]  ;;  %v376_v38 = vsel %vm360_vm1, %v333_v20, 0.0  ;;  %v373_v39 = vsel %vm360_vm1, %v332_v25, 0.0 }
  0x1a   : > { %3192 = vst [vmem:[#allocation9_spill] sm:$0xff] %v2326_v26  ;;  %3193 = vst [vmem:[#allocation10_spill] sm:$0xff] %v2328_v27  ;;  %v2340_v36 = vmul.f32 -2.0, %v274_v34  ;;  %v334_v40 = vmul.f32 %v270_v23, %v270_v23  ;;  %v2345_v41 = vmul.f32 -2.0, %v277_v37  ;;  %v276_v42 = vld [vmem:[%s2283_s20 + $0x60] sm:$0xff]  ;;  %v279_v43 = vld [vmem:[%s2283_s20 + $0x78] sm:$0xff]  ;;  %v337_v50 = vmul.f32 %v273_v28, %v273_v28 }
  0x1b   : > { %3194 = vst [vmem:[#allocation11_spill] sm:$0xff] %v2331_v29  ;;  %3195 = vst [vmem:[#allocation12_spill] sm:$0xff] %v2335_v32  ;;  %371 = vadd.xlane.f32.xlu1 %v370_v19  ;;  %365 = vadd.xlane.f32.xlu0 %v364_v24  ;;  %v2349_v44 = vmul.f32 -2.0, %v276_v42  ;;  %v2351_v45 = vmul.f32 -2.0, %v279_v43  ;;  %v278_v46 = vld [vmem:[%s2283_s20 + $0x70] sm:$0xff]  ;;  %v281_v48 = vld [vmem:[%s2283_s20 + $0x88] sm:$0xff]  ;;  %v336_v55 = vmul.f32 %v272_v30, %v272_v30 }
  0x1c   : > { %3196 = vst [vmem:[#allocation13_spill] sm:$0xff] %v2337_v33  ;;  %3197 = vst [vmem:[#allocation14_spill] sm:$0xff] %v2340_v36  ;;  %v2354_v47 = vmul.f32 -2.0, %v278_v46  ;;  %v382_v49 = vsel %vm360_vm1, %v335_v35, 0.0  ;;  %v2358_v51 = vmul.f32 -2.0, %v281_v48  ;;  %v280_v52 = vld [vmem:[%s2283_s20 + $0x80] sm:$0xff]  ;;  %v339_v8 = vmul.f32 %v275_v31, %v275_v31 }
  0x1d   : > { %3198 = vst [vmem:[#allocation15_spill] sm:$0xff] %v2345_v41  ;;  %3199 = vst [vmem:[#allocation16_spill] sm:$0xff] %v2349_v44  ;;  %v283_v53 = vld [vmem:[%s2283_s20 + $0x98] sm:$0xff]  ;;  %v379_v54 = vsel %vm360_vm1, %v334_v40, 0.0  ;;  %v2363_v56 = vmul.f32 -2.0, %v280_v52  ;;  %v282_v58 = vld [vmem:[%s2283_s20 + $0x90] sm:$0xff]  ;;  %v338_v9 = vmul.f32 %v274_v34, %v274_v34  ;;  %v341_v22 = vmul.f32 %v277_v37, %v277_v37 }
  0x1e   : > { %3200 = vst [vmem:[#allocation17_spill] sm:$0xff] %v2351_v45  ;;  %3201 = vst [vmem:[#allocation18_spill] sm:$0xff] %v2354_v47  ;;  %v2365_v57 = vmul.f32 -2.0, %v283_v53  ;;  %v2368_v59 = vmul.f32 -2.0, %v282_v58  ;;  %v285_v60 = vld [vmem:[%s2283_s20 + $0xa8] sm:$0xff]  ;;  %v284_v62 = vld [vmem:[%s2283_s20 + $0xa0] sm:$0xff]  ;;  %v340_v30 = vmul.f32 %v276_v42, %v276_v42 }
  0x1f   : > { %377 = vadd.xlane.f32.xlu1 %v376_v38  ;;  %374 = vadd.xlane.f32.xlu0 %v373_v39  ;;  %3202 = vst [vmem:[#allocation19_spill] sm:$0xff] %v2358_v51  ;;  %3203 = vst [vmem:[#allocation20_spill] sm:$0xff] %v2363_v56  ;;  %v2371_v61 = vmul.f32 -2.0, %v285_v60  ;;  %v287_v63 = vld [vmem:[%s2283_s20 + $0xb8] sm:$0xff]  ;;  %v388_v1 = vsel %vm360_vm1, %v337_v50, 0.0  ;;  %v2376_v2 = vmul.f32 -2.0, %v284_v62 }
  0x20   : > { %3204 = vst [vmem:[#allocation21_spill] sm:$0xff] %v2365_v57  ;;  %3205 = vst [vmem:[#allocation22_spill] sm:$0xff] %v2368_v59  ;;  %v2378_v3 = vmul.f32 -2.0, %v287_v63  ;;  %v286_v4 = vld [vmem:[%s2283_s20 + $0xb0] sm:$0xff]  ;;  %v385_v6 = vsel %vm360_vm1, %v336_v55, 0.0  ;;  %v289_v12 = vld [vmem:[%s2283_s20 + $0xc8] sm:$0xff]  ;;  %v342_v55 = vmul.f32 %v278_v46, %v278_v46 }
  0x21   : > { %3206 = vst [vmem:[#allocation23_spill] sm:$0xff] %v2371_v61  ;;  %3207 = vst [vmem:[#allocation24_spill] sm:$0xff] %v2376_v2  ;;  %v2382_v10 = vmul.f32 -2.0, %v286_v4  ;;  %v2385_v14 = vmul.f32 -2.0, %v289_v12  ;;  %v288_v15 = vld [vmem:[%s2283_s20 + $0xc0] sm:$0xff]  ;;  %v291_v16 = vld [vmem:[%s2283_s20 + $0xd8] sm:$0xff] }
  0x22   : > { %3208 = vst [vmem:[#allocation25_spill] sm:$0xff] %v2378_v3  ;;  %v2389_v17 = vmul.f32 -2.0, %v288_v15  ;;  %v2391_v19 = vmul.f32 -2.0, %v291_v16  ;;  %v290_v20 = vld [vmem:[%s2283_s20 + $0xd0] sm:$0xff]  ;;  %v293_v24 = vld [vmem:[%s2283_s20 + $0xe8] sm:$0xff]  ;;  %v394_v25 = vsel %vm360_vm1, %v339_v8, 0.0  ;;  %v344_v8 = vmul.f32 %v280_v52, %v280_v52 }
  0x23   : > { %383 = vadd.xlane.f32.xlu1 %v382_v49  ;;  %380 = vadd.xlane.f32.xlu0 %v379_v54  ;;  %3209 = vst [vmem:[#allocation26_spill] sm:$0xff] %v2382_v10  ;;  %3210 = vst [vmem:[#allocation27_spill] sm:$0xff] %v2385_v14  ;;  %v2394_v23 = vmul.f32 -2.0, %v290_v20  ;;  %v391_v28 = vsel %vm360_vm1, %v338_v9, 0.0  ;;  %v2399_v31 = vmul.f32 -2.0, %v293_v24  ;;  %v292_v34 = vld [vmem:[%s2283_s20 + $0xe0] sm:$0xff]  ;;  %v343_v54 = vmul.f32 %v279_v43, %v279_v43 }
  0x24   : > { %3211 = vst [vmem:[#allocation28_spill] sm:$0xff] %v2389_v17  ;;  %3212 = vst [vmem:[#allocation29_spill] sm:$0xff] %v2391_v19  ;;  %v295_v35 = vld [vmem:[%s2283_s20 + $0xf8] sm:$0xff]  ;;  %v2403_v38 = vmul.f32 -2.0, %v292_v34  ;;  %v294_v40 = vld [vmem:[%s2283_s20 + $0xf0] sm:$0xff]  ;;  %v400_v37 = vsel %vm360_vm1, %v341_v22, 0.0  ;;  %v346_v22 = vmul.f32 %v282_v58, %v282_v58 }
  0x25   : > { %3213 = vst [vmem:[#allocation30_spill] sm:$0xff] %v2394_v23  ;;  %3214 = vst [vmem:[#allocation31_spill] sm:$0xff] %v2399_v31  ;;  %v2405_v39 = vmul.f32 -2.0, %v295_v35  ;;  %v2408_v49 = vmul.f32 -2.0, %v294_v40  ;;  %v397_v50 = vsel %vm360_vm1, %v340_v30, 0.0  ;;  %v406_v42 = vsel %vm360_vm1, %v343_v54, 0.0 }
  0x26   : > { %3215 = vst [vmem:[#allocation32_spill] sm:$0xff] %v2403_v38  ;;  %v415_v46 = vsel %vm360_vm1, %v346_v22, 0.0  ;;  %v349_v30 = vmul.f32 %v285_v60, %v285_v60  ;;  %v350_v54 = vmul.f32 %v286_v4, %v286_v4 }
  0x27   : > { %389 = vadd.xlane.f32.xlu1 %v388_v1  ;;  %386 = vadd.xlane.f32.xlu0 %v385_v6  ;;  %3216 = vst [vmem:[#allocation33_spill] sm:$0xff] %v2405_v39  ;;  %3217 = vst [vmem:[#allocation34_spill] sm:$0xff] %v2408_v49  ;;  %v403_v1 = vsel %vm360_vm1, %v342_v55, 0.0  ;;  %v345_v6 = vmul.f32 %v281_v48, %v281_v48  ;;  %v353_v55 = vmul.f32 %v289_v12, %v289_v12 }
  0x28   : > { %v424_v48 = vsel %vm360_vm1, %v349_v30, 0.0  ;;  %v427_v58 = vsel %vm360_vm1, %v350_v54, 0.0 }
  0x29   : > { %v412_v9 = vsel %vm360_vm1, %v345_v6, 0.0  ;;  %v436_v60 = vsel %vm360_vm1, %v353_v55, 0.0  ;;  %v354_v6 = vmul.f32 %v290_v20, %v290_v20 }
  0x2b   : > { %395 = vadd.xlane.f32.xlu1 %v394_v25  ;;  %392 = vadd.xlane.f32.xlu0 %v391_v28  ;;  %v409_v25 = vsel %vm360_vm1, %v344_v8, 0.0  ;;  %v347_v28 = vmul.f32 %v283_v53, %v283_v53  ;;  %v439_v4 = vsel %vm360_vm1, %v354_v6, 0.0  ;;  %v357_v8 = vmul.f32 %v293_v24, %v293_v24 }
  0x2d   : > { %v418_v43 = vsel %vm360_vm1, %v347_v28, 0.0  ;;  %v448_v12 = vsel %vm360_vm1, %v357_v8, 0.0  ;;  %v358_v28 = vmul.f32 %v294_v40, %v294_v40 }
  0x2f   : > { %401 = vadd.xlane.f32.xlu1 %v400_v37  ;;  %398 = vadd.xlane.f32.xlu0 %v397_v50  ;;  %v348_v37 = vmul.f32 %v284_v62, %v284_v62  ;;  %v351_v50 = vmul.f32 %v287_v63, %v287_v63  ;;  %v451_v20 = vsel %vm360_vm1, %v358_v28, 0.0 }
  0x31   : > { %v421_v52 = vsel %vm360_vm1, %v348_v37, 0.0  ;;  %v430_v53 = vsel %vm360_vm1, %v351_v50, 0.0 }
  0x33   : > { %407 = vadd.xlane.f32.xlu1 %v406_v42  ;;  %404 = vadd.xlane.f32.xlu0 %v403_v1  ;;  %v352_v42 = vmul.f32 %v288_v15, %v288_v15  ;;  %v355_v1 = vmul.f32 %v291_v16, %v291_v16 }
  0x35   : > { %v433_v62 = vsel %vm360_vm1, %v352_v42, 0.0  ;;  %v442_v63 = vsel %vm360_vm1, %v355_v1, 0.0 }
  0x37   : > { %413 = vadd.xlane.f32.xlu1 %v412_v9  ;;  %410 = vadd.xlane.f32.xlu0 %v409_v25  ;;  %v356_v9 = vmul.f32 %v292_v34, %v292_v34  ;;  %v359_v25 = vmul.f32 %v295_v35, %v295_v35 }
  0x39   : > { %v445_v15 = vsel %vm360_vm1, %v356_v9, 0.0  ;;  %v454_v16 = vsel %vm360_vm1, %v359_v25, 0.0 }
  0x3b   : > { %419 = vadd.xlane.f32.xlu1 %v418_v43  ;;  %416 = vadd.xlane.f32.xlu0 %v415_v46 }
  0x3f   : > { %425 = vadd.xlane.f32.xlu1 %v424_v48  ;;  %422 = vadd.xlane.f32.xlu0 %v421_v52 }
  0x43   : > { %431 = vadd.xlane.f32.xlu1 %v430_v53  ;;  %428 = vadd.xlane.f32.xlu0 %v427_v58 }
  0x47   : > { %437 = vadd.xlane.f32.xlu1 %v436_v60  ;;  %434 = vadd.xlane.f32.xlu0 %v433_v62 }
  0x4b   : > { %443 = vadd.xlane.f32.xlu1 %v442_v63  ;;  %440 = vadd.xlane.f32.xlu0 %v439_v4 }
  0x4f   : > { %449 = vadd.xlane.f32.xlu1 %v448_v12  ;;  %446 = vadd.xlane.f32.xlu0 %v445_v15 }
  0x53   : > { %455 = vadd.xlane.f32.xlu1 %v454_v16  ;;  %452 = vadd.xlane.f32.xlu0 %v451_v20 }
  0xa4   : > { %v2430_v22 = vpop.xlane.xlu1 %368  ;;  %v2432_v24 = vpop.xlane.xlu0 %362 }
  0xa5   : > { %3218 = vst [vmem:[#allocation35_spill] sm:$0xff] %v2430_v22  ;;  %3219 = vst [vmem:[#allocation36_spill] sm:$0xff] %v2432_v24  ;;  %v2544_v22 = vmov inf   ;;  %v2552_v24 = vmov inf  }
  0xa8   : > { %v2434_v34 = vpop.xlane.xlu1 %371  ;;  %v2436_v43 = vpop.xlane.xlu0 %365 }
  0xa9   : > { %3220 = vst [vmem:[#allocation37_spill] sm:$0xff] %v2434_v34  ;;  %3221 = vst [vmem:[#allocation38_spill] sm:$0xff] %v2436_v43  ;;  %v2548_v34 = vmov inf   ;;  %v2556_v43 = vmov inf  }
  0xac   : > { %v2438_v46 = vpop.xlane.xlu1 %377  ;;  %v2440_v35 = vpop.xlane.xlu0 %374 }
  0xad   : > { %3222 = vst [vmem:[#allocation39_spill] sm:$0xff] %v2438_v46  ;;  %3223 = vst [vmem:[#allocation40_spill] sm:$0xff] %v2440_v35  ;;  %v2550_v35 = vmov inf   ;;  %v2554_v46 = vmov inf  }
  0xb0   : > { %v2442_v40 = vpop.xlane.xlu1 %383  ;;  %v2444_v30 = vpop.xlane.xlu0 %380 }
  0xb1   : > { %3224 = vst [vmem:[#allocation41_spill] sm:$0xff] %v2442_v40  ;;  %3225 = vst [vmem:[#allocation42_spill] sm:$0xff] %v2444_v30  ;;  %v2542_v30 = vmov inf   ;;  %v2546_v40 = vmov inf  }
  0xb4   : > { %v2446_v37 = vpop.xlane.xlu1 %389  ;;  %v2448_v48 = vpop.xlane.xlu0 %386 }
  0xb5   : > { %3226 = vst [vmem:[#allocation43_spill] sm:$0xff] %v2446_v37  ;;  %3227 = vst [vmem:[#allocation44_spill] sm:$0xff] %v2448_v48  ;;  %v2538_v48 = vmov inf   ;;  %v2540_v37 = vmov inf  }
  0xb8   : > { %v2450_v52 = vpop.xlane.xlu1 %395  ;;  %v2452_v50 = vpop.xlane.xlu0 %392 }
  0xb9   : > { %3228 = vst [vmem:[#allocation45_spill] sm:$0xff] %v2450_v52  ;;  %3229 = vst [vmem:[#allocation46_spill] sm:$0xff] %v2452_v50  ;;  %v2534_v50 = vmov inf   ;;  %v2536_v52 = vmov inf  }
  0xbc   : > { %v2454_v54 = vpop.xlane.xlu1 %401  ;;  %v2456_v53 = vpop.xlane.xlu0 %398 }
  0xbd   : > { %3230 = vst [vmem:[#allocation47_spill] sm:$0xff] %v2454_v54  ;;  %3231 = vst [vmem:[#allocation48_spill] sm:$0xff] %v2456_v53  ;;  %v2522_v53 = vmov inf   ;;  %v2526_v54 = vmov inf  }
  0xc0   : > { %v2458_v58 = vpop.xlane.xlu1 %407  ;;  %v2460_v55 = vpop.xlane.xlu0 %404 }
  0xc1   : > { %3232 = vst [vmem:[#allocation49_spill] sm:$0xff] %v2458_v58  ;;  %3233 = vst [vmem:[#allocation50_spill] sm:$0xff] %v2460_v55  ;;  %v2494_v55 = vmov inf   ;;  %v2516_v58 = vmov inf  }
  0xc4   : > { %v2462_v42 = vpop.xlane.xlu1 %413  ;;  %v2464_v60 = vpop.xlane.xlu0 %410 }
  0xc5   : > { %3234 = vst [vmem:[#allocation51_spill] sm:$0xff] %v2462_v42  ;;  %3235 = vst [vmem:[#allocation52_spill] sm:$0xff] %v2464_v60  ;;  %v2530_v60 = vmov inf   ;;  %v2532_v42 = vmov inf  }
  0xc8   : > { %v2466_v62 = vpop.xlane.xlu1 %419  ;;  %v2468_v1 = vpop.xlane.xlu0 %416 }
  0xc9   : > { %3236 = vst [vmem:[#allocation53_spill] sm:$0xff] %v2466_v62  ;;  %3237 = vst [vmem:[#allocation54_spill] sm:$0xff] %v2468_v1  ;;  %v2524_v1 = vmov inf   ;;  %v2528_v62 = vmov inf  }
  0xcc   : > { %v2470_v6 = vpop.xlane.xlu1 %425  ;;  %v2472_v63 = vpop.xlane.xlu0 %422 }
  0xcd   : > { %3238 = vst [vmem:[#allocation55_spill] sm:$0xff] %v2470_v6  ;;  %3239 = vst [vmem:[#allocation56_spill] sm:$0xff] %v2472_v63  ;;  %v2518_v63 = vmov inf   ;;  %v2520_v6 = vmov inf  }
  0xd0   : > { %v2474_v4 = vpop.xlane.xlu1 %431  ;;  %v2476_v8 = vpop.xlane.xlu0 %428 }
  0xd1   : > { %3240 = vst [vmem:[#allocation57_spill] sm:$0xff] %v2474_v4  ;;  %3241 = vst [vmem:[#allocation58_spill] sm:$0xff] %v2476_v8  ;;  %v2496_v4 = vmov inf   ;;  %v2498_v8 = vmov inf  }
  0xd4   : > { %v2478_v9 = vpop.xlane.xlu1 %437  ;;  %v2480_v12 = vpop.xlane.xlu0 %434 }
  0xd5   : > { %3242 = vst [vmem:[#allocation59_spill] sm:$0xff] %v2478_v9  ;;  %3243 = vst [vmem:[#allocation60_spill] sm:$0xff] %v2480_v12  ;;  %v2500_v9 = vmov inf   ;;  %v2502_v12 = vmov inf  }
  0xd8   : > { %v2482_v15 = vpop.xlane.xlu1 %443  ;;  %v2484_v25 = vpop.xlane.xlu0 %440 }
  0xd9   : > { %3244 = vst [vmem:[#allocation61_spill] sm:$0xff] %v2482_v15  ;;  %3245 = vst [vmem:[#allocation62_spill] sm:$0xff] %v2484_v25  ;;  %v2504_v15 = vmov inf   ;;  %v2506_v25 = vmov inf  }
  0xdc   : > { %v2486_v28 = vpop.xlane.xlu1 %449  ;;  %v2488_v16 = vpop.xlane.xlu0 %446 }
  0xdd   : > { %3246 = vst [vmem:[#allocation63_spill] sm:$0xff] %v2486_v28  ;;  %3247 = vst [vmem:[#allocation64_spill] sm:$0xff] %v2488_v16  ;;  %v2508_v28 = vmov inf   ;;  %v2510_v16 = vmov inf  }
  0xe0   : > { %v2490_v20 = vpop.xlane.xlu1 %455  ;;  %v2492_v0 = vpop.xlane.xlu0 %452 }
  0xe1   : > { %3248 = vst [vmem:[#allocation65_spill] sm:$0xff] %v2490_v20  ;;  %3249 = vst [vmem:[#allocation66_spill] sm:$0xff] %v2492_v0  ;;  %v2512_v20 = vmov inf   ;;  %v2514_v0 = vmov inf  }
  0xe2 LB: >> { %3250 = vst [vmem:[#allocation67_spill] sm:$0xff] %v2115_v4  ;;  %v3251_v7 = vld [vmem:[#allocation4_spill] sm:$0xff]  ;;  %s1540_s5 = sshll.u32 %s2239_s4, 7  ;;  %v3253_v13 = vld [vmem:[#allocation6_spill] sm:$0xff]  ;;  %v3254_v51 = vld [vmem:[#allocation19_spill] sm:$0xff]  ;;  %s474_s10 = sadd.s32 1, %s2239_s4   ;;  %s2239_s4 = sphi %s2558_s4, %s3382_s4   ;;  %v2235_v43 = vphi %v2556_v43, %v3381_v43   ;;  %v2231_v46 = vphi %v2554_v46, %v3380_v46   ;;  %v2227_v24 = vphi %v2552_v24, %v3379_v24   ;;  %v2223_v35 = vphi %v2550_v35, %v3378_v35   ;;  %v2219_v34 = vphi %v2548_v34, %v3377_v34   ;;  %v2215_v40 = vphi %v2546_v40, %v3376_v40   ;;  %v2211_v22 = vphi %v2544_v22, %v3375_v22   ;;  %v2207_v30 = vphi %v2542_v30, %v3374_v30   ;;  %v2203_v37 = vphi %v2540_v37, %v3373_v37   ;;  %v2199_v48 = vphi %v2538_v48, %v3372_v48   ;;  %v2195_v52 = vphi %v2536_v52, %v3371_v52   ;;  %v2191_v50 = vphi %v2534_v50, %v3370_v50   ;;  %v2187_v42 = vphi %v2532_v42, %v3369_v42   ;;  %v2183_v60 = vphi %v2530_v60, %v3368_v60   ;;  %v2179_v62 = vphi %v2528_v62, %v3367_v62   ;;  %v2175_v54 = vphi %v2526_v54, %v3366_v54   ;;  %v2171_v1 = vphi %v2524_v1, %v3365_v1   ;;  %v2167_v53 = vphi %v2522_v53, %v3364_v53   ;;  %v2163_v6 = vphi %v2520_v6, %v3363_v6   ;;  %v2159_v63 = vphi %v2518_v63, %v3362_v63   ;;  %v2155_v58 = vphi %v2516_v58, %v3361_v58   ;;  %v2151_v0 = vphi %v2514_v0, %v3360_v0   ;;  %v2147_v20 = vphi %v2512_v20, %v3359_v20   ;;  %v2143_v16 = vphi %v2510_v16, %v3358_v16   ;;  %v2139_v28 = vphi %v2508_v28, %v3357_v28   ;;  %v2135_v25 = vphi %v2506_v25, %v3356_v25   ;;  %v2131_v15 = vphi %v2504_v15, %v3355_v15   ;;  %v2127_v12 = vphi %v2502_v12, %v3354_v12   ;;  %v2123_v9 = vphi %v2500_v9, %v3353_v9   ;;  %v2119_v8 = vphi %v2498_v8, %v3352_v8   ;;  %v2115_v4 = vphi %v2496_v4, %v3351_v4   ;;  %v2111_v55 = vphi %v2494_v55, %v3350_v55  }
  0xe3   : >> { %1614 = vmatprep.mubr.msk.f32.mxu0 %vm360_vm1, %v3251_v7  ;;  %v3252_v56 = vld [vmem:[#allocation20_spill] sm:$0xff]  ;;  %s2660_s6 = sshra.s32 %s1540_s5, 7  ;;  %v3255_v5 = vld [vmem:[#allocation3_spill] sm:$0xff]  ;;  %v3256_v59 = vld [vmem:[#allocation22_spill] sm:$0xff]  ;;  %p2938_p5 = scmp.ge.s32.totalorder %s474_s10, 2  }
  0xe4   : >> { %1638 = vmatprep.mubr.msk.f32.mxu1 %vm360_vm1, %v3252_v56  ;;  %s1541_s7 = sshll.u32 %s2660_s6, 3  ;;  %v3257_v11 = vld [vmem:[#allocation5_spill] sm:$0xff]  ;;  %v3259_v21 = vld [vmem:[#allocation8_spill] sm:$0xff]  ;;  %v3261_v18 = vld [vmem:[#allocation7_spill] sm:$0xff]  ;;  %s946_s9 = scalar_lea.vmem %s2302_s30, %s2660_s6  ;;  %vm1252_vm3 = vcmask (%p2938_p5), 7168  }
  0xe5   : >> { %s511_s8 = scalar_lea.vmem %s2288_s23, %s1541_s7  ;;  %v3258_v57 = vld [vmem:[#allocation21_spill] sm:$0xff]  ;;  %v3260_v2 = vld [vmem:[#allocation24_spill] sm:$0xff]  ;;  %v3262_v61 = vld [vmem:[#allocation23_spill] sm:$0xff]  ;;  %s3382_s4 = smov %s474_s10 }
  0xe6   : >> { %v512_v4 = vld [vmem:[%s511_s8] sm:$0xff]  ;;  %v3263_v27 = vld [vmem:[#allocation10_spill] sm:$0xff]  ;;  %v3265_v26 = vld [vmem:[#allocation9_spill] sm:$0xff] }
  0xe7   : >> { %1612 = vmatprep.subr.mxu0 %v512_v4  ;;  %1662 = vmatprep.subr.mxu1 %v512_v4  ;;  %v3264_v10 = vld [vmem:[#allocation26_spill] sm:$0xff]  ;;  %v3266_v3 = vld [vmem:[#allocation25_spill] sm:$0xff]  ;;  %v3267_v32 = vld [vmem:[#allocation12_spill] sm:$0xff] }
  0xe8   : >> { %1613 = vmatpush3.msra.mxu0 %v512_v4  ;;  %1663 = vmatpush3.msra.mxu1 %v512_v4  ;;  %v3268_v17 = vld [vmem:[#allocation28_spill] sm:$0xff]  ;;  %v3269_v29 = vld [vmem:[#allocation11_spill] sm:$0xff]  ;;  %v3271_v36 = vld [vmem:[#allocation14_spill] sm:$0xff] }
  0xe9   : >> { %1615 = vmatmul.mubr.msk.f32.vlgmr.msra.gmra.mrb[0].mxu0 %vm360_vm1, %v3253_v13  ;;  %1639 = vmatmul.mubr.msk.f32.vlgmr.msra.gmra.mrb[0].mxu1 %vm360_vm1, %v3254_v51  ;;  %v3270_v14 = vld [vmem:[#allocation27_spill] sm:$0xff]  ;;  %v3272_v23 = vld [vmem:[#allocation30_spill] sm:$0xff]  ;;  %v3273_v33 = vld [vmem:[#allocation13_spill] sm:$0xff] }
  0xea   : >> { %1617 = vmatprep.mubr.msk.f32.mxu0 %vm360_vm1, %v3255_v5  ;;  %1641 = vmatprep.mubr.msk.f32.mxu1 %vm360_vm1, %v3256_v59  ;;  %v3274_v19 = vld [vmem:[#allocation29_spill] sm:$0xff]  ;;  %v3275_v44 = vld [vmem:[#allocation16_spill] sm:$0xff]  ;;  %v3277_v41 = vld [vmem:[#allocation15_spill] sm:$0xff] }
  0xeb   : >> { %v3276_v38 = vld [vmem:[#allocation32_spill] sm:$0xff]  ;;  %v3278_v31 = vld [vmem:[#allocation31_spill] sm:$0xff]  ;;  %v3279_v47 = vld [vmem:[#allocation18_spill] sm:$0xff] }
  0xec   : >> { %v3280_v49 = vld [vmem:[#allocation34_spill] sm:$0xff]  ;;  %v3281_v45 = vld [vmem:[#allocation17_spill] sm:$0xff] }
  0xed   : >> { %1618 = vmatmul.mubr.msk.f32.gmra.mrb[2].mxu0 %vm360_vm1, %v3257_v11  ;;  %1642 = vmatmul.mubr.msk.f32.gmra.mrb[2].mxu1 %vm360_vm1, %v3258_v57  ;;  %v3282_v39 = vld [vmem:[#allocation33_spill] sm:$0xff] }
  0xee   : >> { %1620 = vmatprep.mubr.msk.f32.mxu0 %vm360_vm1, %v3259_v21  ;;  %1644 = vmatprep.mubr.msk.f32.mxu1 %vm360_vm1, %v3260_v2  ;;  %v513_v2 = vmul.f32 %v512_v4, %v512_v4 }
  0xf1   : >> { %1621 = vmatmul.mubr.msk.f32.gmra.mrb[4].mxu0 %vm360_vm1, %v3261_v18  ;;  %1645 = vmatmul.mubr.msk.f32.gmra.mrb[4].mxu1 %vm360_vm1, %v3262_v61 }
  0xf2   : >> { %1623 = vmatprep.mubr.msk.f32.mxu0 %vm360_vm1, %v3263_v27  ;;  %1647 = vmatprep.mubr.msk.f32.mxu1 %vm360_vm1, %v3264_v10 }
  0xf5   : >> { %1624 = vmatmul.mubr.msk.f32.gmra.mrb[6].mxu0 %vm360_vm1, %v3265_v26  ;;  %1648 = vmatmul.mubr.msk.f32.gmra.mrb[6].mxu1 %vm360_vm1, %v3266_v3  ;;  %v514_v3 = vrot.slane %v513_v2, 4 }
  0xf6   : >> { %1626 = vmatprep.mubr.msk.f32.mxu0 %vm360_vm1, %v3267_v32  ;;  %1650 = vmatprep.mubr.msk.f32.mxu1 %vm360_vm1, %v3268_v17 }
  0xf7   : >> { %v515_v5 = vadd.f32 %v514_v3, %v513_v2 }
  0xf9   : >> { %1627 = vmatmul.mubr.msk.f32.gmra.mrb[8].mxu0 %vm360_vm1, %v3269_v29  ;;  %1651 = vmatmul.mubr.msk.f32.gmra.mrb[8].mxu1 %vm360_vm1, %v3270_v14  ;;  %v516_v7 = vrot.slane %v515_v5, 2 }
  0xfa   : >> { %1629 = vmatprep.mubr.msk.f32.mxu0 %vm360_vm1, %v3271_v36  ;;  %1653 = vmatprep.mubr.msk.f32.mxu1 %vm360_vm1, %v3272_v23 }
  0xfb   : >> { %v517_v10 = vadd.f32 %v516_v7, %v515_v5 }
  0xfd   : >> { %1630 = vmatmul.mubr.msk.f32.gmra.mrb[10].mxu0 %vm360_vm1, %v3273_v33  ;;  %1654 = vmatmul.mubr.msk.f32.gmra.mrb[10].mxu1 %vm360_vm1, %v3274_v19  ;;  %v518_v11 = vrot.slane %v517_v10, 1  ;;  %v3291_v33 = vld [vmem:[#allocation38_spill] sm:$0xff] }
  0xfe   : >> { %1632 = vmatprep.mubr.msk.f32.mxu0 %vm360_vm1, %v3275_v44  ;;  %1656 = vmatprep.mubr.msk.f32.mxu1 %vm360_vm1, %v3276_v38  ;;  %v3293_v38 = vld [vmem:[#allocation39_spill] sm:$0xff] }
  0xff   : >> { %v2724_v13 = vadd.f32 %v518_v11, %v517_v10 }
 0x101   : >> { %1633 = vmatmul.mubr.msk.f32.gmra.mrb[12].mxu0 %vm360_vm1, %v3277_v41  ;;  %1657 = vmatmul.mubr.msk.f32.gmra.mrb[12].mxu1 %vm360_vm1, %v3278_v31 }
 0x102   : >> { %1635 = vmatprep.mubr.msk.f32.mxu0 %vm360_vm1, %v3279_v47  ;;  %1659 = vmatprep.mubr.msk.f32.mxu1 %vm360_vm1, %v3280_v49 }
 0x105   : >> { %1636 = vmatmul.mubr.msk.f32.gmra.mrb[14].mxu0 %vm360_vm1, %v3281_v45  ;;  %1660 = vmatmul.mubr.msk.f32.gmra.mrb[14].mxu1 %vm360_vm1, %v3282_v39 }
 0x1bc   : >> { %v1616_v14 = vpop.f32.mrb[0].mxu0  ;;  %v1640_v17 = vpop.f32.mrb[0].mxu1 }
 0x1bd   : >> { %v688_v18 = vadd.f32 %v1616_v14, %v2724_v13  ;;  %v682_v19 = vpop.f32.mrb[1].mxu0  ;;  %v2728_v21 = vadd.f32 %v1640_v17, %v2724_v13  ;;  %v762_v23 = vpop.f32.mrb[1].mxu1 }
 0x1be   : >> { %v683_v26 = vadd.f32 %v682_v19, %v2724_v13  ;;  %v2732_v4 = vadd.f32 %v762_v23, %v2724_v13 }
 0x1bf   : >> { %v2734_v46 = vmin.f32 %v2231_v46, %v688_v18   ;;  %v2738_v53 = vmin.f32 %v2167_v53, %v2728_v21  }
 0x1c0   : >> { %v2740_v43 = vmin.f32 %v2235_v43, %v683_v26   ;;  %v1619_v11 = vpop.f32.mrb[2].mxu0  ;;  %v2744_v1 = vmin.f32 %v2171_v1, %v2732_v4   ;;  %v1643_v10 = vpop.f32.mrb[2].mxu1 }
 0x1c1   : >> { %3283 = vst [vmem:[#allocation68_spill] sm:$0xff] %v2734_v46  ;;  %v3284_v5 = vmov %v2738_v53  ;;  %v698_v14 = vadd.f32 %v1619_v11, %v2724_v13  ;;  %v692_v17 = vpop.f32.mrb[3].mxu0  ;;  %v2748_v19 = vadd.f32 %v1643_v10, %v2724_v13  ;;  %v772_v23 = vpop.f32.mrb[3].mxu1 }
 0x1c2   : >> { %3285 = vst [vmem:[#allocation69_spill] sm:$0xff] %v2740_v43  ;;  %v3286_v3 = vmov %v2744_v1  ;;  %v693_v46 = vadd.f32 %v692_v17, %v2724_v13  ;;  %v2752_v27 = vadd.f32 %v772_v23, %v2724_v13 }
 0x1c3   : >> { %v2755_v35 = vmin.f32 %v2223_v35, %v698_v14   ;;  %v2759_v63 = vmin.f32 %v2159_v63, %v2748_v19  }
 0x1c4   : >> { %v2762_v24 = vmin.f32 %v2227_v24, %v693_v46   ;;  %v1622_v43 = vpop.f32.mrb[4].mxu0  ;;  %v2766_v6 = vmin.f32 %v2163_v6, %v2752_v27   ;;  %v1646_v53 = vpop.f32.mrb[4].mxu1 }
 0x1c5   : >> { %3287 = vst [vmem:[#allocation70_spill] sm:$0xff] %v2755_v35  ;;  %v3288_v31 = vmov %v2759_v63  ;;  %v708_v1 = vadd.f32 %v1622_v43, %v2724_v13  ;;  %v702_v17 = vpop.f32.mrb[5].mxu0  ;;  %v2770_v23 = vadd.f32 %v1646_v53, %v2724_v13  ;;  %v782_v35 = vpop.f32.mrb[5].mxu1  ;;  %v3295_v43 = vld [vmem:[#allocation36_spill] sm:$0xff] }
 0x1c6   : >> { %3289 = vst [vmem:[#allocation71_spill] sm:$0xff] %v2762_v24  ;;  %v3290_v10 = vmov %v2766_v6  ;;  %v703_v32 = vadd.f32 %v702_v17, %v2724_v13  ;;  %v2774_v63 = vadd.f32 %v782_v35, %v2724_v13  ;;  %v874_v24 = vadd.f32 %v688_v18, %v3291_v33  ;;  %v3297_v17 = vld [vmem:[#allocation40_spill] sm:$0xff] }
 0x1c7   : >> { %v2778_v40 = vmin.f32 %v2215_v40, %v708_v1   ;;  %v878_v6 = vadd.f32 %v708_v1, %v3293_v38  ;;  %v2783_v0 = vmin.f32 %v2151_v0, %v2770_v23   ;;  %v873_v53 = vadd.f32 %v683_v26, %v3295_v43 }
 0x1c8   : >> { %v2787_v34 = vmin.f32 %v2219_v34, %v703_v32   ;;  %v877_v44 = vadd.f32 %v703_v32, %v3297_v17  ;;  %v1625_v35 = vpop.f32.mrb[6].mxu0  ;;  %v2792_v58 = vmin.f32 %v2155_v58, %v2774_v63   ;;  %v1649_v33 = vpop.f32.mrb[6].mxu1  ;;  %v3299_v32 = vld [vmem:[#allocation37_spill] sm:$0xff] }
 0x1c9   : >> { %3292 = vst [vmem:[#allocation72_spill] sm:$0xff] %v2778_v40  ;;  %v3294_v39 = vmov %v2783_v0  ;;  %v906_v40 = vmin.f32 %v874_v24, %v878_v6  ;;  %v718_v38 = vadd.f32 %v1625_v35, %v2724_v13  ;;  %v712_v1 = vpop.f32.mrb[7].mxu0  ;;  %v2796_v45 = vadd.f32 %v1649_v33, %v2724_v13  ;;  %v792_v0 = vpop.f32.mrb[7].mxu1  ;;  %v3303_v6 = vld [vmem:[#allocation35_spill] sm:$0xff] }
 0x1ca   : >> { %3296 = vst [vmem:[#allocation73_spill] sm:$0xff] %v2787_v34  ;;  %v3298_v18 = vmov %v2792_v58  ;;  %v905_v26 = vmin.f32 %v873_v53, %v877_v44  ;;  %v713_v43 = vadd.f32 %v712_v1, %v2724_v13  ;;  %v2800_v34 = vadd.f32 %v792_v0, %v2724_v13  ;;  %v3301_v58 = vld [vmem:[#allocation41_spill] sm:$0xff]  ;;  %v3305_v53 = vld [vmem:[#allocation42_spill] sm:$0xff] }
 0x1cb   : >> { %v876_v17 = vadd.f32 %v698_v14, %v3299_v32  ;;  %v2804_v30 = vmin.f32 %v2207_v30, %v718_v38   ;;  %v880_v24 = vadd.f32 %v718_v38, %v3301_v58  ;;  %v2809_v16 = vmin.f32 %v2143_v16, %v2796_v45  }
 0x1cc   : >> { %v875_v35 = vadd.f32 %v693_v46, %v3303_v6  ;;  %v2813_v22 = vmin.f32 %v2211_v22, %v713_v43   ;;  %v879_v33 = vadd.f32 %v713_v43, %v3305_v53  ;;  %v1628_v1 = vpop.f32.mrb[8].mxu0  ;;  %v2818_v20 = vmin.f32 %v2147_v20, %v2800_v34   ;;  %v1652_v0 = vpop.f32.mrb[8].mxu1  ;;  %v3308_v43 = vld [vmem:[#allocation43_spill] sm:$0xff] }
 0x1cd   : >> { %v3300_v47 = vmov %v2804_v30  ;;  %v3302_v49 = vmov %v2809_v16  ;;  %v908_v30 = vmin.f32 %v876_v17, %v880_v24  ;;  %v728_v38 = vadd.f32 %v1628_v1, %v2724_v13  ;;  %v722_v32 = vpop.f32.mrb[9].mxu0  ;;  %v802_v16 = vpop.f32.mrb[9].mxu1  ;;  %v3311_v24 = vld [vmem:[#allocation44_spill] sm:$0xff] }
 0x1ce   : >> { %v3304_v44 = vmov %v2813_v22  ;;  %v3306_v14 = vmov %v2818_v20  ;;  %v2822_v58 = vadd.f32 %v1652_v0, %v2724_v13  ;;  %v907_v46 = vmin.f32 %v875_v35, %v879_v33 }
 0x1cf   : >> { %v723_v6 = vadd.f32 %v722_v32, %v2724_v13  ;;  %v2826_v22 = vadd.f32 %v802_v16, %v2724_v13  ;;  %v2829_v48 = vmin.f32 %v2199_v48, %v728_v38   ;;  %v882_v20 = vadd.f32 %v728_v38, %v3308_v43 }
 0x1d0   : >> { %v2834_v25 = vmin.f32 %v2135_v25, %v2822_v58   ;;  %v1631_v35 = vpop.f32.mrb[10].mxu0  ;;  %v1655_v1 = vpop.f32.mrb[10].mxu1 }
 0x1d1   : >> { %v3307_v51 = vmov %v2829_v48  ;;  %v2837_v37 = vmin.f32 %v2203_v37, %v723_v6   ;;  %v881_v53 = vadd.f32 %v723_v6, %v3311_v24  ;;  %v2842_v28 = vmin.f32 %v2139_v28, %v2826_v22   ;;  %v732_v32 = vpop.f32.mrb[11].mxu0  ;;  %v812_v16 = vpop.f32.mrb[11].mxu1  ;;  %v3314_v6 = vld [vmem:[#allocation45_spill] sm:$0xff] }
 0x1d2   : >> { %v3309_v17 = vmov %v2834_v25  ;;  %v910_v0 = vmin.f32 %v906_v40, %v882_v20  ;;  %v738_v48 = vadd.f32 %v1631_v35, %v2724_v13  ;;  %v2846_v38 = vadd.f32 %v1655_v1, %v2724_v13  ;;  %v3317_v40 = vld [vmem:[#allocation46_spill] sm:$0xff] }
 0x1d3   : >> { %v3310_v56 = vmov %v2837_v37  ;;  %v3312_v33 = vmov %v2842_v28  ;;  %v909_v25 = vmin.f32 %v905_v26, %v881_v53  ;;  %v733_v43 = vadd.f32 %v732_v32, %v2724_v13  ;;  %v3319_v53 = vld [vmem:[#allocation51_spill] sm:$0xff] }
 0x1d4   : >> { %v2850_v37 = vadd.f32 %v812_v16, %v2724_v13  ;;  %v2853_v50 = vmin.f32 %v2191_v50, %v738_v48   ;;  %v884_v28 = vadd.f32 %v738_v48, %v3314_v6  ;;  %v2858_v12 = vmin.f32 %v2127_v12, %v2846_v38   ;;  %v1634_v26 = vpop.f32.mrb[12].mxu0  ;;  %v1658_v24 = vpop.f32.mrb[12].mxu1  ;;  %v3320_v6 = vld [vmem:[#allocation52_spill] sm:$0xff] }
 0x1d5   : >> { %v2861_v52 = vmin.f32 %v2195_v52, %v733_v43   ;;  %v883_v20 = vadd.f32 %v733_v43, %v3317_v40  ;;  %v748_v1 = vadd.f32 %v1634_v26, %v2724_v13  ;;  %v742_v48 = vpop.f32.mrb[13].mxu0  ;;  %v822_v16 = vpop.f32.mrb[13].mxu1 }
 0x1d6   : >> { %v3313_v57 = vmov %v2853_v50  ;;  %v3315_v59 = vmov %v2858_v12  ;;  %v2866_v15 = vmin.f32 %v2131_v15, %v2850_v37   ;;  %v890_v50 = vadd.f32 %v2728_v21, %v3319_v53 }
 0x1d7   : >> { %v3316_v61 = vmov %v2861_v52  ;;  %v912_v35 = vmin.f32 %v908_v30, %v884_v28  ;;  %v828_v12 = vadd.f32 %v1658_v24, %v2724_v13  ;;  %v889_v52 = vadd.f32 %v2732_v4, %v3320_v6  ;;  %v3323_v30 = vld [vmem:[#allocation47_spill] sm:$0xff]  ;;  %v3325_v24 = vld [vmem:[#allocation54_spill] sm:$0xff]  ;;  %v3327_v4 = vld [vmem:[#allocation48_spill] sm:$0xff] }
 0x1d8   : >> { %v3318_v32 = vmov %v2866_v15  ;;  %v911_v43 = vmin.f32 %v907_v46, %v883_v20  ;;  %v743_v40 = vadd.f32 %v742_v48, %v2724_v13  ;;  %v823_v7 = vadd.f32 %v822_v16, %v2724_v13  ;;  %v3321_v15 = vld [vmem:[#allocation53_spill] sm:$0xff]  ;;  %v1637_v20 = vpop.f32.mrb[14].mxu0  ;;  %v1661_v48 = vpop.f32.mrb[14].mxu1  ;;  %v3329_v16 = vld [vmem:[#allocation55_spill] sm:$0xff] }
 0x1d9   : >> { %v892_v2 = vadd.f32 %v2748_v19, %v3321_v15  ;;  %v2879_v60 = vmin.f32 %v2183_v60, %v748_v1   ;;  %v886_v28 = vadd.f32 %v748_v1, %v3323_v30  ;;  %v2883_v8 = vmin.f32 %v2119_v8, %v828_v12   ;;  %v3330_v30 = vld [vmem:[#allocation56_spill] sm:$0xff] }
 0x1da   : >> { %v891_v53 = vadd.f32 %v2752_v27, %v3325_v24  ;;  %v2888_v42 = vmin.f32 %v2187_v42, %v743_v40   ;;  %v885_v46 = vadd.f32 %v743_v40, %v3327_v4  ;;  %v2892_v9 = vmin.f32 %v2123_v9, %v823_v7   ;;  %v832_v27 = vpop.f32.mrb[15].mxu1 }
 0x1db   : >> { %v3322_v21 = vmov %v2879_v60  ;;  %v3324_v26 = vmov %v2883_v8  ;;  %v894_v60 = vadd.f32 %v2770_v23, %v3329_v16  ;;  %v914_v1 = vmin.f32 %v910_v0, %v886_v28  ;;  %v752_v8 = vpop.f32.mrb[15].mxu0  ;;  %v3332_v23 = vld [vmem:[#allocation49_spill] sm:$0xff]  ;;  %v3334_v28 = vld [vmem:[#allocation59_spill] sm:$0xff] }
 0x1dc   : >> { %v3326_v11 = vmov %v2888_v42  ;;  %v3328_v19 = vmov %v2892_v9  ;;  %v758_v6 = vadd.f32 %v1637_v20, %v2724_v13  ;;  %v838_v15 = vadd.f32 %v1661_v48, %v2724_v13 }
 0x1dd   : >> { %v893_v42 = vadd.f32 %v2774_v63, %v3330_v30  ;;  %v913_v24 = vmin.f32 %v909_v25, %v885_v46  ;;  %v753_v40 = vadd.f32 %v752_v8, %v2724_v13  ;;  %v833_v4 = vadd.f32 %v832_v27, %v2724_v13  ;;  %v3336_v63 = vld [vmem:[#allocation50_spill] sm:$0xff]  ;;  %v3337_v13 = vld [vmem:[#allocation63_spill] sm:$0xff]  ;;  %v3341_v30 = vld [vmem:[#allocation64_spill] sm:$0xff] }
 0x1de   : >> { %v918_v9 = vmin.f32 %v914_v1, %v890_v50  ;;  %v2903_v54 = vmin.f32 %v2175_v54, %v758_v6   ;;  %v888_v0 = vadd.f32 %v758_v6, %v3332_v23  ;;  %v2907_v55 = vmin.f32 %v2111_v55, %v838_v15   ;;  %v3338_v1 = vld [vmem:[#allocation67_spill] sm:$0xff]  ;;  %v3340_v6 = vld [vmem:[#allocation60_spill] sm:$0xff] }
 0x1df   : >> { %v898_v20 = vadd.f32 %v2822_v58, %v3334_v28  ;;  %v917_v48 = vmin.f32 %v913_v24, %v889_v52  ;;  %v2912_v62 = vmin.f32 %v2179_v62, %v753_v40   ;;  %v887_v25 = vadd.f32 %v753_v40, %v3336_v63  ;;  %v3342_v52 = vld [vmem:[#allocation57_spill] sm:$0xff]  ;;  %v3343_v40 = vld [vmem:[#allocation58_spill] sm:$0xff] }
 0x1e0   : >> { %v3331_v29 = vmov %v2903_v54  ;;  %v3333_v41 = vmov %v2907_v55  ;;  %v916_v46 = vmin.f32 %v912_v35, %v888_v0  ;;  %v902_v50 = vadd.f32 %v828_v12, %v3337_v13  ;;  %v3345_v13 = vld [vmem:[#allocation65_spill] sm:$0xff] }
 0x1e1   : >> { %v3335_v36 = vmov %v2912_v62  ;;  %v922_v16 = vmin.f32 %v918_v9, %v894_v60  ;;  %v2917_v54 = vmin.f32 %v3338_v1, %v833_v4   ;;  %v897_v8 = vadd.f32 %v2826_v22, %v3340_v6  ;;  %v3344_v9 = vld [vmem:[#allocation61_spill] sm:$0xff] }
 0x1e2   : >> { %v915_v55 = vmin.f32 %v911_v43, %v887_v25  ;;  %v901_v23 = vadd.f32 %v823_v7, %v3341_v30  ;;  %v921_v58 = vmin.f32 %v917_v48, %v893_v42  ;;  %v896_v24 = vadd.f32 %v2796_v45, %v3342_v52  ;;  %v3346_v25 = vld [vmem:[#allocation62_spill] sm:$0xff]  ;;  %v947_v30 = vld [vmem:[%s946_s9] sm:$0x1] }
 0x1e3   : >> { %v3339_v27 = vmov %v2917_v54  ;;  %v920_v62 = vmin.f32 %v916_v46, %v892_v2  ;;  %v926_v28 = vmin.f32 %v922_v16, %v898_v20  ;;  %v895_v35 = vadd.f32 %v2800_v34, %v3343_v40  ;;  %v3347_v2 = vld [vmem:[#allocation66_spill] sm:$0xff]  ;;  %v3376_v40 = vld [vmem:[#allocation72_spill] sm:$0xff] }
 0x1e4   : >> { %v919_v12 = vmin.f32 %v915_v55, %v891_v53  ;;  %v925_v60 = vmin.f32 %v921_v58, %v897_v8  ;;  %v900_v0 = vadd.f32 %v2846_v38, %v3344_v9  ;;  %v904_v22 = vadd.f32 %v838_v15, %v3345_v13  ;;  %v3383_v13 = vld [vmem:[#allocation71_spill] sm:$0xff] (%p2938_p5) }
 0x1e5   : >> { %v930_v63 = vmin.f32 %v926_v28, %v902_v50  ;;  %v924_v43 = vmin.f32 %v920_v62, %v896_v24  ;;  %v899_v7 = vadd.f32 %v2850_v37, %v3346_v25  ;;  %v903_v42 = vadd.f32 %v833_v4, %v3347_v2  ;;  %v3379_v24 = vld [vmem:[#allocation71_spill] sm:$0xff]  ;;  %1128 = vmin.xlane.f32.xlu1 (%p2938_p5), %v3383_v13  ;;  %v3386_v2 = vld [vmem:[#allocation68_spill] sm:$0xff] (%p2938_p5)  ;;  %v3403_v13 = vld [vmem:[#allocation49_spill] sm:$0xff] (%p2938_p5) }
 0x1e6   : >> { %v929_v45 = vmin.f32 %v925_v60, %v901_v23  ;;  %v923_v20 = vmin.f32 %v919_v12, %v895_v35  ;;  %v3348_v23 = vlaneseq  ;;  %v3353_v9 = vmov %v3328_v19  ;;  %v3378_v35 = vld [vmem:[#allocation70_spill] sm:$0xff]  ;;  %v3396_v24 = vld [vmem:[#allocation42_spill] sm:$0xff] (%p2938_p5) }
 0x1e7   : >> { %v928_v48 = vmin.f32 %v924_v43, %v900_v0  ;;  %v3354_v12 = vmov %v3315_v59  ;;  %v3356_v25 = vmov %v3309_v17  ;;  %v3357_v28 = vmov %v3312_v33  ;;  %v3381_v43 = vld [vmem:[#allocation69_spill] sm:$0xff] }
 0x1e8   : >> { %v933_v34 = vmin.f32 %v929_v45, %v930_v63  ;;  %v927_v53 = vmin.f32 %v923_v20, %v899_v7  ;;  %vm951_vm2 = vcmp.lt.s32.totalorder %v3348_v23, 128  ;;  %v3359_v20 = vmov %v3306_v14  ;;  %v3384_v7 = vld [vmem:[#allocation69_spill] sm:$0xff] (%p2938_p5)  ;;  %v3385_v45 = vld [vmem:[#allocation70_spill] sm:$0xff] (%p2938_p5) }
 0x1e9   : >> { %v932_v46 = vmin.f32 %v928_v48, %v904_v22  ;;  %v3360_v0 = vmov %v3294_v39  ;;  %v3361_v58 = vmov %v3298_v18  ;;  %v3362_v63 = vmov %v3288_v31  ;;  %1124 = vmin.xlane.f32.xlu0 (%p2938_p5), %v3384_v7  ;;  %1130 = vmin.xlane.f32.xlu1 (%p2938_p5), %v3385_v45  ;;  %v3388_v23 = vld [vmem:[#allocation73_spill] sm:$0xff] (%p2938_p5)  ;;  %v3399_v20 = vld [vmem:[#allocation45_spill] sm:$0xff] (%p2938_p5)  ;;  %v3404_v45 = vld [vmem:[#allocation50_spill] sm:$0xff] (%p2938_p5) }
 0x1ea   : >> { %v931_v16 = vmin.f32 %v927_v53, %v903_v42  ;;  %v3364_v53 = vmov %v3284_v5  ;;  %v3367_v62 = vmov %v3335_v36  ;;  %v3368_v60 = vmov %v3322_v21  ;;  %v3395_v58 = vld [vmem:[#allocation41_spill] sm:$0xff] (%p2938_p5)  ;;  %v3398_v0 = vld [vmem:[#allocation44_spill] sm:$0xff] (%p2938_p5) }
 0x1eb   : >> { %v3369_v42 = vmov %v3326_v11  ;;  %v3371_v52 = vmov %v3316_v61  ;;  %v3372_v48 = vmov %v3307_v51  ;;  %v3375_v22 = vmov %v3304_v44  ;;  %v3397_v60 = vld [vmem:[#allocation43_spill] sm:$0xff] (%p2938_p5) }
 0x1ec   : >> { %v934_v1 = vmin.f32 %v931_v16, %v932_v46  ;;  %v3358_v16 = vmov %v3302_v49  ;;  %v3380_v46 = vld [vmem:[#allocation68_spill] sm:$0xff] }
 0x1ed   : > { %1126 = vmin.xlane.f32.xlu0 (%p2938_p5), %v3386_v2 }
 0x1ee   : >> { %v935_v38 = vmin.f32 %v933_v34, %v934_v1  ;;  %v3365_v1 = vmov %v3286_v3  ;;  %v3377_v34 = vld [vmem:[#allocation73_spill] sm:$0xff] }
 0x1ef   : > { %v3400_v34 = vld [vmem:[#allocation46_spill] sm:$0xff] (%p2938_p5) }
 0x1f0   : >> { %v936_v50 = vrot.slane %v935_v38, 4 }
 0x1f1   : > { %1132 = vmin.xlane.f32.xlu0 (%p2938_p5), %v3388_v23 }
 0x1f2   : >> { %v937_v54 = vmin.f32 %v935_v38, %v936_v50  ;;  %v3370_v50 = vmov %v3313_v57  ;;  %v3387_v38 = vld [vmem:[#allocation72_spill] sm:$0xff] (%p2938_p5) }
 0x1f3   : > { %1134 = vmin.xlane.f32.xlu1 (%p2938_p5), %v3387_v38 }
 0x1f4   : >> { %v938_v15 = vrot.slane %v937_v54, 2 }
 0x1f5   : > { %1136 = vmin.xlane.f32.xlu0 (%p2938_p5), %v3304_v44 }
 0x1f6   : >> { %v939_v6 = vmin.f32 %v937_v54, %v938_v15  ;;  %v3355_v15 = vmov %v3318_v32  ;;  %v3366_v54 = vmov %v3331_v29 }
 0x1f7   : > { %1138 = vmin.xlane.f32.xlu1 (%p2938_p5), %v3300_v47  ;;  %v3401_v54 = vld [vmem:[#allocation47_spill] sm:$0xff] (%p2938_p5) }
 0x1f8   : >> { %v940_v8 = vrot.slane %v939_v6, 1 }
 0x1f9   : > { %1140 = vmin.xlane.f32.xlu0 (%p2938_p5), %v3310_v56 }
 0x1fa   : >> { %v941_v55 = vmin.f32 %v939_v6, %v940_v8  ;;  %v3352_v8 = vmov %v3324_v26  ;;  %v3363_v6 = vmov %v3290_v10  ;;  %473 = sbr.rel (!%p2938_p5) target bundleno = 226 (0xe2), region = 98 }
 0x1fb   : > { %1142 = vmin.xlane.f32.xlu1 (%p2938_p5), %v3307_v51  ;;  %v3402_v6 = vld [vmem:[#allocation48_spill] sm:$0xff] (%p2938_p5) }
 0x1fc   : >> { %v942_v37 = vmax.f32 %v941_v55, 0.0  ;;  %v3350_v55 = vmov %v3333_v41 }
 0x1fd   : > { %1144 = vmin.xlane.f32.xlu0 (%p2938_p5), %v3316_v61 }
 0x1fe   : >> { %v948_v4 = vmin.f32 %v947_v30, %v942_v37  ;;  %v3373_v37 = vmov %v3310_v56  ;;  %v3374_v30 = vmov %v3300_v47  ;;  %v3389_v47 = vld [vmem:[#allocation35_spill] sm:$0xff] (%p2938_p5)  ;;  %v3390_v56 = vld [vmem:[#allocation36_spill] sm:$0xff] (%p2938_p5) }
 0x1ff   : > { %1146 = vmin.xlane.f32.xlu1 (%p2938_p5), %v3313_v57 }
 0x200   : >> { %953 = vst.msk [vmem:[%s946_s9] sm:$0x1] %vm951_vm2, %v948_v4  ;;  %v3351_v4 = vmov %v3339_v27 }
 0x201   : > { %1148 = vmin.xlane.f32.xlu0 %v3326_v11 }
 0x203   : > { %1150 = vmin.xlane.f32.xlu1 %v3322_v21 }
 0x205   : > { %1152 = vmin.xlane.f32.xlu0 %v3335_v36 }
 0x207   : > { %1154 = vmin.xlane.f32.xlu1 %v3331_v29 }
 0x209   : > { %1156 = vmin.xlane.f32.xlu0 %v3286_v3 }
 0x20b   : > { %1158 = vmin.xlane.f32.xlu1 %v3284_v5  ;;  %v3392_v5 = vld [vmem:[#allocation38_spill] sm:$0xff] }
 0x20d   : > { %1160 = vmin.xlane.f32.xlu0 %v3290_v10 }
 0x20f   : > { %1162 = vmin.xlane.f32.xlu1 %v3288_v31 }
 0x211   : > { %1164 = vmin.xlane.f32.xlu0 %v3298_v18 }
 0x213   : > { %1166 = vmin.xlane.f32.xlu1 %v3294_v39 }
 0x215   : > { %1168 = vmin.xlane.f32.xlu0 %v3306_v14  ;;  %v3393_v14 = vld [vmem:[#allocation39_spill] sm:$0xff] }
 0x217   : > { %1170 = vmin.xlane.f32.xlu1 %v3302_v49 }
 0x219   : > { %1172 = vmin.xlane.f32.xlu0 %v3312_v33  ;;  %v3394_v33 = vld [vmem:[#allocation40_spill] sm:$0xff] }
 0x21b   : > { %1174 = vmin.xlane.f32.xlu1 %v3309_v17 }
 0x21d   : > { %1176 = vmin.xlane.f32.xlu0 %v3318_v32 }
 0x21f   : > { %1178 = vmin.xlane.f32.xlu1 %v3315_v59 }
 0x221   : > { %1180 = vmin.xlane.f32.xlu0 %v3328_v19 }
 0x223   : > { %1182 = vmin.xlane.f32.xlu1 %v3324_v26 }
 0x225   : > { %1184 = vmin.xlane.f32.xlu0 %v3339_v27 }
 0x227   : > { %1186 = vmin.xlane.f32.xlu1 %v3333_v41  ;;  %v3391_v41 = vld [vmem:[#allocation37_spill] sm:$0xff] }
 0x272   : > { %v1129_v29 = vpop.xlane.xlu1 %1128 }
 0x273   : > { %v1190_v51 = vadd.f32 %v1129_v29, %v3389_v47  ;;  %v3405_v47 = vld [vmem:[#allocation51_spill] sm:$0xff] }
 0x275   : > { %v1222_v59 = vmax.f32 %v1190_v51, 0.0 }
 0x276   : > { %v1125_v36 = vpop.xlane.xlu0 %1124  ;;  %v1131_v31 = vpop.xlane.xlu1 %1130 }
 0x277   : > { %v1188_v57 = vadd.f32 %v1125_v36, %v3390_v56  ;;  %1255 = vst.msk [vmem:[%s2294_s26 + $0x10] sm:$0xff] %vm1252_vm3, %v1222_v59  ;;  %v1191_v49 = vadd.f32 %v1131_v31, %v3391_v41  ;;  %v3406_v56 = vld [vmem:[#allocation52_spill] sm:$0xff]  ;;  %v3407_v41 = vld [vmem:[#allocation53_spill] sm:$0xff] }
 0x279   : > { %v1220_v61 = vmax.f32 %v1188_v57, 0.0  ;;  %v1223_v11 = vmax.f32 %v1191_v49, 0.0 }
 0x27a   : > { %v1127_v39 = vpop.xlane.xlu0 %1126 }
 0x27b   : > { %1253 = vst.msk [vmem:[%s2294_s26] sm:$0xff] %vm1252_vm3, %v1220_v61  ;;  %v1189_v3 = vadd.f32 %v1127_v39, %v3392_v5  ;;  %1256 = vst.msk [vmem:[%s2294_s26 + $0x18] sm:$0xff] %vm1252_vm3, %v1223_v11  ;;  %v3408_v5 = vld [vmem:[#allocation54_spill] sm:$0xff] }
 0x27d   : > { %v1221_v10 = vmax.f32 %v1189_v3, 0.0 }
 0x27e   : > { %v1133_v44 = vpop.xlane.xlu0 %1132 }
 0x27f   : > { %1254 = vst.msk [vmem:[%s2294_s26 + $0x8] sm:$0xff] %vm1252_vm3, %v1221_v10  ;;  %v1192_v32 = vadd.f32 %v1133_v44, %v3394_v33  ;;  %v3410_v33 = vld [vmem:[#allocation56_spill] sm:$0xff] }
 0x280   : > { %v1135_v18 = vpop.xlane.xlu1 %1134 }
 0x281   : > { %v1193_v17 = vadd.f32 %v1135_v18, %v3393_v14  ;;  %v1224_v26 = vmax.f32 %v1192_v32, 0.0  ;;  %v3409_v14 = vld [vmem:[#allocation55_spill] sm:$0xff] }
 0x282   : > { %v1137_v27 = vpop.xlane.xlu0 %1136 }
 0x283   : > { %v1225_v21 = vmax.f32 %v1193_v17, 0.0  ;;  %1257 = vst.msk [vmem:[%s2294_s26 + $0x20] sm:$0xff] %vm1252_vm3, %v1224_v26  ;;  %v1194_v62 = vadd.f32 %v1137_v27, %v3396_v24  ;;  %v3412_v24 = vld [vmem:[#allocation58_spill] sm:$0xff] }
 0x284   : > { %v1139_v19 = vpop.xlane.xlu1 %1138 }
 0x285   : > { %1258 = vst.msk [vmem:[%s2294_s26 + $0x28] sm:$0xff] %vm1252_vm3, %v1225_v21  ;;  %v1195_v52 = vadd.f32 %v1139_v19, %v3395_v58  ;;  %v1226_v40 = vmax.f32 %v1194_v62, 0.0  ;;  %v3411_v58 = vld [vmem:[#allocation57_spill] sm:$0xff] }
 0x286   : > { %v1141_v12 = vpop.xlane.xlu0 %1140 }
 0x287   : > { %v1227_v28 = vmax.f32 %v1195_v52, 0.0  ;;  %1259 = vst.msk [vmem:[%s2294_s26 + $0x30] sm:$0xff] %vm1252_vm3, %v1226_v40  ;;  %v1196_v63 = vadd.f32 %v1141_v12, %v3398_v0  ;;  %v3414_v0 = vld [vmem:[#allocation60_spill] sm:$0xff] }
 0x288   : > { %v1143_v35 = vpop.xlane.xlu1 %1142 }
 0x289   : > { %1260 = vst.msk [vmem:[%s2294_s26 + $0x38] sm:$0xff] %vm1252_vm3, %v1227_v28  ;;  %v1197_v9 = vadd.f32 %v1143_v35, %v3397_v60  ;;  %v1228_v43 = vmax.f32 %v1196_v63, 0.0  ;;  %v3413_v60 = vld [vmem:[#allocation59_spill] sm:$0xff] }
 0x28a   : > { %v1145_v42 = vpop.xlane.xlu0 %1144 }
 0x28b   : > { %v1229_v22 = vmax.f32 %v1197_v9, 0.0  ;;  %1261 = vst.msk [vmem:[%s2294_s26 + $0x40] sm:$0xff] %vm1252_vm3, %v1228_v43  ;;  %v1198_v53 = vadd.f32 %v1145_v42, %v3400_v34  ;;  %v3416_v34 = vld [vmem:[#allocation62_spill] sm:$0xff] }
 0x28c   : > { %v1147_v25 = vpop.xlane.xlu1 %1146 }
 0x28d   : > { %1262 = vst.msk [vmem:[%s2294_s26 + $0x48] sm:$0xff] %vm1252_vm3, %v1229_v22  ;;  %v1199_v48 = vadd.f32 %v1147_v25, %v3399_v20  ;;  %v1230_v16 = vmax.f32 %v1198_v53, 0.0  ;;  %v3415_v20 = vld [vmem:[#allocation61_spill] sm:$0xff] }
 0x28e   : > { %v1149_v50 = vpop.xlane.xlu0 %1148 }
 0x28f   : > { %v1231_v46 = vmax.f32 %v1199_v48, 0.0  ;;  %1263 = vst.msk [vmem:[%s2294_s26 + $0x50] sm:$0xff] %vm1252_vm3, %v1230_v16  ;;  %v1200_v8 = vadd.f32 %v1149_v50, %v3402_v6  ;;  %v3418_v6 = vld [vmem:[#allocation64_spill] sm:$0xff] }
 0x290   : > { %v1151_v1 = vpop.xlane.xlu1 %1150 }
 0x291   : > { %1264 = vst.msk [vmem:[%s2294_s26 + $0x58] sm:$0xff] %vm1252_vm3, %v1231_v46  ;;  %v1201_v15 = vadd.f32 %v1151_v1, %v3401_v54  ;;  %v1232_v30 = vmax.f32 %v1200_v8, 0.0  ;;  %v3417_v54 = vld [vmem:[#allocation63_spill] sm:$0xff] }
 0x292   : > { %v1153_v4 = vpop.xlane.xlu0 %1152 }
 0x293   : > { %v1233_v55 = vmax.f32 %v1201_v15, 0.0  ;;  %1265 = vst.msk [vmem:[%s2294_s26 + $0x60] sm:$0xff] %vm1252_vm3, %v1232_v30  ;;  %v1202_v2 = vadd.f32 %v1153_v4, %v3404_v45  ;;  %v3420_v45 = vld [vmem:[#allocation66_spill] sm:$0xff] }
 0x294   : > { %v1155_v37 = vpop.xlane.xlu1 %1154 }
 0x295   : > { %1266 = vst.msk [vmem:[%s2294_s26 + $0x68] sm:$0xff] %vm1252_vm3, %v1233_v55  ;;  %v1203_v7 = vadd.f32 %v1155_v37, %v3403_v13  ;;  %v1234_v23 = vmax.f32 %v1202_v2, 0.0  ;;  %v3419_v13 = vld [vmem:[#allocation65_spill] sm:$0xff] }
 0x296   : > { %v1157_v36 = vpop.xlane.xlu0 %1156 }
 0x297   : > { %v1235_v38 = vmax.f32 %v1203_v7, 0.0  ;;  %1267 = vst.msk [vmem:[%s2294_s26 + $0x70] sm:$0xff] %vm1252_vm3, %v1234_v23  ;;  %v1204_v57 = vadd.f32 %v1157_v36, %v3406_v56 }
 0x298   : > { %v1159_v29 = vpop.xlane.xlu1 %1158 }
 0x299   : > { %1268 = vst.msk [vmem:[%s2294_s26 + $0x78] sm:$0xff] %vm1252_vm3, %v1235_v38  ;;  %v1205_v51 = vadd.f32 %v1159_v29, %v3405_v47  ;;  %v1236_v61 = vmax.f32 %v1204_v57, 0.0 }
 0x29a   : > { %v1161_v39 = vpop.xlane.xlu0 %1160 }
 0x29b   : > { %v1237_v59 = vmax.f32 %v1205_v51, 0.0  ;;  %1269 = vst.msk [vmem:[%s2294_s26 + $0x80] sm:$0xff] %vm1252_vm3, %v1236_v61  ;;  %v1206_v3 = vadd.f32 %v1161_v39, %v3408_v5 }
 0x29c   : > { %v1163_v31 = vpop.xlane.xlu1 %1162 }
 0x29d   : > { %1270 = vst.msk [vmem:[%s2294_s26 + $0x88] sm:$0xff] %vm1252_vm3, %v1237_v59  ;;  %v1207_v49 = vadd.f32 %v1163_v31, %v3407_v41  ;;  %v1238_v10 = vmax.f32 %v1206_v3, 0.0 }
 0x29e   : > { %v1165_v44 = vpop.xlane.xlu0 %1164 }
 0x29f   : > { %v1239_v11 = vmax.f32 %v1207_v49, 0.0  ;;  %1271 = vst.msk [vmem:[%s2294_s26 + $0x90] sm:$0xff] %vm1252_vm3, %v1238_v10  ;;  %v1208_v32 = vadd.f32 %v1165_v44, %v3410_v33 }
 0x2a0   : > { %v1167_v18 = vpop.xlane.xlu1 %1166 }
 0x2a1   : > { %1272 = vst.msk [vmem:[%s2294_s26 + $0x98] sm:$0xff] %vm1252_vm3, %v1239_v11  ;;  %v1209_v17 = vadd.f32 %v1167_v18, %v3409_v14  ;;  %v1240_v26 = vmax.f32 %v1208_v32, 0.0 }
 0x2a2   : > { %v1169_v27 = vpop.xlane.xlu0 %1168 }
 0x2a3   : > { %v1241_v21 = vmax.f32 %v1209_v17, 0.0  ;;  %1273 = vst.msk [vmem:[%s2294_s26 + $0xa0] sm:$0xff] %vm1252_vm3, %v1240_v26  ;;  %v1210_v62 = vadd.f32 %v1169_v27, %v3412_v24 }
 0x2a4   : > { %v1171_v19 = vpop.xlane.xlu1 %1170 }
 0x2a5   : > { %1274 = vst.msk [vmem:[%s2294_s26 + $0xa8] sm:$0xff] %vm1252_vm3, %v1241_v21  ;;  %v1211_v52 = vadd.f32 %v1171_v19, %v3411_v58  ;;  %v1242_v40 = vmax.f32 %v1210_v62, 0.0 }
 0x2a6   : > { %v1173_v12 = vpop.xlane.xlu0 %1172 }
 0x2a7   : > { %v1243_v28 = vmax.f32 %v1211_v52, 0.0  ;;  %1275 = vst.msk [vmem:[%s2294_s26 + $0xb0] sm:$0xff] %vm1252_vm3, %v1242_v40  ;;  %v1212_v63 = vadd.f32 %v1173_v12, %v3414_v0 }
 0x2a8   : > { %v1175_v35 = vpop.xlane.xlu1 %1174 }
 0x2a9   : > { %1276 = vst.msk [vmem:[%s2294_s26 + $0xb8] sm:$0xff] %vm1252_vm3, %v1243_v28  ;;  %v1213_v9 = vadd.f32 %v1175_v35, %v3413_v60  ;;  %v1244_v43 = vmax.f32 %v1212_v63, 0.0 }
 0x2aa   : > { %v1177_v42 = vpop.xlane.xlu0 %1176 }
 0x2ab   : > { %v1245_v22 = vmax.f32 %v1213_v9, 0.0  ;;  %1277 = vst.msk [vmem:[%s2294_s26 + $0xc0] sm:$0xff] %vm1252_vm3, %v1244_v43  ;;  %v1214_v53 = vadd.f32 %v1177_v42, %v3416_v34 }
 0x2ac   : > { %v1179_v25 = vpop.xlane.xlu1 %1178 }
 0x2ad   : > { %1278 = vst.msk [vmem:[%s2294_s26 + $0xc8] sm:$0xff] %vm1252_vm3, %v1245_v22  ;;  %v1215_v48 = vadd.f32 %v1179_v25, %v3415_v20  ;;  %v1246_v16 = vmax.f32 %v1214_v53, 0.0 }
 0x2ae   : > { %v1181_v50 = vpop.xlane.xlu0 %1180 }
 0x2af   : > { %v1247_v46 = vmax.f32 %v1215_v48, 0.0  ;;  %1279 = vst.msk [vmem:[%s2294_s26 + $0xd0] sm:$0xff] %vm1252_vm3, %v1246_v16  ;;  %v1216_v8 = vadd.f32 %v1181_v50, %v3418_v6 }
 0x2b0   : > { %v1183_v1 = vpop.xlane.xlu1 %1182 }
 0x2b1   : > { %1280 = vst.msk [vmem:[%s2294_s26 + $0xd8] sm:$0xff] %vm1252_vm3, %v1247_v46  ;;  %v1217_v15 = vadd.f32 %v1183_v1, %v3417_v54  ;;  %v1248_v30 = vmax.f32 %v1216_v8, 0.0 }
 0x2b2   : > { %v1185_v4 = vpop.xlane.xlu0 %1184 }
 0x2b3   : > { %v1249_v55 = vmax.f32 %v1217_v15, 0.0  ;;  %1281 = vst.msk [vmem:[%s2294_s26 + $0xe0] sm:$0xff] %vm1252_vm3, %v1248_v30  ;;  %v1218_v2 = vadd.f32 %v1185_v4, %v3420_v45 }
 0x2b4   : > { %v1187_v37 = vpop.xlane.xlu1 %1186 }
 0x2b5   : > { %1282 = vst.msk [vmem:[%s2294_s26 + $0xe8] sm:$0xff] %vm1252_vm3, %v1249_v55  ;;  %v1219_v7 = vadd.f32 %v1187_v37, %v3419_v13  ;;  %v1250_v23 = vmax.f32 %v1218_v2, 0.0 }
 0x2b7   : > { %v1251_v38 = vmax.f32 %v1219_v7, 0.0  ;;  %1283 = vst.msk [vmem:[%s2294_s26 + $0xf0] sm:$0xff] %vm1252_vm3, %v1250_v23 }
 0x2b9   : > { %1284 = vst.msk [vmem:[%s2294_s26 + $0xf8] sm:$0xff] %vm1252_vm3, %v1251_v38 }
 0x2ba PF: > { %s14_s14 = sadd.s32 1, %s2107_s14   ;;  %s3421_s12 = smov %s2103_s13 }
 0x2bb   : > { %p11_p6 = scmp.ge.s32.totalorder %s14_s14, 4   ;;  %s3422_s13 = smov %s3424_s15 }
 0x2bd   :  { %13 = sbr.rel (!%p11_p6) target bundleno = 2 (0x2), region = 109 }

</bundles_post_ra>
